<compile_context>
chip_gen: v7x
topology: tpu7x:2x2x1
jax: 0.10.0
libtpu: 0.0.40
codegen_flags: <defaults>
</compile_context>

<pallas_src>
import functools
import math

import jax
import jax.numpy as jnp
import numpy as np
from jax import lax
from jax.experimental import pallas as pl
from jax.experimental.pallas import tpu as pltpu

# ------------------------------------------------------------------------------------------
# Configuration (mirrors NeighborhoodAttention.__init__ + update_me_essentials)
# ------------------------------------------------------------------------------------------
EMB_DIM = 32                       # emb_dim (small synthetic size)
NUM_POS_FEAT = EMB_DIM // 2
SQRT_DIM = float(np.sqrt(EMB_DIM))
INV_SQRT_DIM = 1.0 / SQRT_DIM
STRIDE = 1
LIDAR_RANGE = np.array([-8.0, -8.0, -3.0, 8.0, 8.0, 1.0], np.float32)   # self.lr
VOXEL_SIZE = np.array([1.0, 1.0, 4.0], np.float32)                      # self.vs
RES = (float(VOXEL_SIZE[0]) * STRIDE, float(VOXEL_SIZE[1]) * STRIDE)
SIZE_X = round(float(LIDAR_RANGE[3] - LIDAR_RANGE[0]) / RES[0])          # 16
SIZE_Y = round(float(LIDAR_RANGE[4] - LIDAR_RANGE[1]) / RES[1])          # 16
OFFSET_SZ_X = round(float(LIDAR_RANGE[0]) / RES[0])                      # -8
OFFSET_SZ_Y = round(float(LIDAR_RANGE[1]) / RES[1])                      # -8
N_NBRS = 9
PAD = 2

MAX_ROW_TILE = 1024                # rows per grid step (multiple of 8)


def _round_up(x, m):
    return ((x + m - 1) // m) * m


def _vmem_limit_bytes():
    """Generation-aware scoped-VMEM limit (v7x has 64 MiB physical, v5e/v6e 128 MiB)."""
    try:
        cap = int(pltpu.get_tpu_info().vmem_capacity_bytes)
    except Exception:
        return 32 * 1024 * 1024
    return max(16 * 1024 * 1024, (cap * 3) // 4)


# ------------------------------------------------------------------------------------------
# Pallas kernels
# ------------------------------------------------------------------------------------------
def _encoder_kernel(qpe_ref, vpe_ref, feat_ref,
                    qw1_ref, qb1_ref, qw2_ref, qb2_ref,
                    vw1_ref, vb1_ref, vw2_ref, vb2_ref,
                    swr_ref, sbr_ref, swe_ref, sbe_ref,
                    qout_ref, vout_ref, *, compute_dtype):
    """Fused query-MLP + value-MLP + SE gate (Linear->ReLU->Linear [+ sigmoid gate]).

    Only the matmul operands are cast to `compute_dtype` (bf16 MXU path); all elementwise
    math, biases and accumulation stay f32 (v5e VPU/EUP have no bf16 path).
    """
    def mm(x, w_ref):
        return jnp.dot(x.astype(compute_dtype), w_ref[...].astype(compute_dtype),
                       preferred_element_type=jnp.float32)

    # query pos-encoder
    hq = jnp.maximum(mm(qpe_ref[...], qw1_ref) + qb1_ref[...], 0.0)
    qout_ref[...] = (mm(hq, qw2_ref) + qb2_ref[...]).astype(qout_ref.dtype)

    # value pos-encoder + SE gate, fused so vpos_emb never leaves VMEM
    hv = jnp.maximum(mm(vpe_ref[...], vw1_ref) + vb1_ref[...], 0.0)
    vemb = mm(hv, vw2_ref) + vb2_ref[...]
    hs = jnp.maximum(mm(feat_ref[...], swr_ref) + sbr_ref[...], 0.0)
    gate = jax.nn.sigmoid(mm(hs, swe_ref) + sbe_ref[...])
    vout_ref[...] = (vemb * gate).astype(vout_ref.dtype)


def _nbr_attn_kernel(idx_ref, q_ref, vtbl_ref, ftbl_ref, o_ref, *, compute_dtype):
    """Fused 9-neighbour gather + softmax attention.

    idx_ref : (TQ, N)  int32 neighbour row index into the value tables (-1 = invalid)
    q_ref   : (TQ, D)  query positional embedding (one row per query, no gather needed)
    vtbl_ref: (V, D)   VMEM-resident value positional-embedding table
    ftbl_ref: (V, D)   VMEM-resident value feature table
    o_ref   : (TQ, D)  attended output features

    score[q,n] = <qpos[q], vtbl[idx[q,n]]> / sqrt(D)  is obtained from the dense score
    matrix A = qpos @ vtbl^T (MXU) masked by per-neighbour one-hot selectors; the softmax
    weights are scattered back onto value rows and contracted with ftbl in a single MXU
    matmul.  Invalid neighbours select nothing -> score 0 and zero feature, matching the
    reference's zero padding row exactly.
    """
    V = vtbl_ref.shape[0]
    TQ, N = idx_ref.shape

    q = q_ref[...] * INV_SQRT_DIM                 # fold 1/sqrt(D) into the cheap side
    idx = idx_ref[...]

    # Dense scores of every query row against every value row (MXU, contraction on dim 1).
    A = lax.dot_general(q.astype(compute_dtype), vtbl_ref[...].astype(compute_dtype),
                        (((1,), (1,)), ((), ())),
                        preferred_element_type=jnp.float32)        # (TQ, V) f32

    col = lax.broadcasted_iota(jnp.int32, (TQ, V), 1)

    # Per-neighbour one-hot row selectors and scores (f32 elementwise, lane reduce on XLU).
    onehots = [(col == idx[:, n:n + 1]).astype(jnp.float32) for n in range(N)]
    scores = [jnp.sum(A * oh, axis=-1, keepdims=True) for oh in onehots]     # each (TQ, 1)

    m = scores[0]
    for s in scores[1:]:
        m = jnp.maximum(m, s)
    probs = [jnp.exp(s - m) for s in scores]                                  # EUP
    denom = probs[0]
    for p in probs[1:]:
        denom = denom + p
    inv = pl.reciprocal(denom, approx=True)                                   # (TQ, 1), EUP

    # Unnormalised weight scatter back onto value rows, then one matmul with the features.
    P = probs[0] * onehots[0]
    for p, oh in zip(probs[1:], onehots[1:]):
        P = P + p * oh
    out = jnp.dot(P.astype(compute_dtype), ftbl_ref[...].astype(compute_dtype),
                  preferred_element_type=jnp.float32) * inv                   # (TQ, D)
    # 32-lane-wide store (masked vst) — unavoidable for a (Q, 32) module output; tq is kept
    # maximal so the number of masked stores per grid step is minimised.
    o_ref[...] = out.astype(o_ref.dtype)


# ------------------------------------------------------------------------------------------
# Pallas wrappers
# ------------------------------------------------------------------------------------------
def fused_pos_encoder_pallas(q_pe, v_pe, ctr_feat, p, compute_dtype):
    Q, D = q_pe.shape
    V = v_pe.shape[0]
    H = p['q_w1'].shape[1]

    # Equal tile counts for the query/value rows so no block is ever revisited and the grid
    # axis can be marked "parallel" (v7x 2-TC sharding).
    n = max(pl.cdiv(Q, MAX_ROW_TILE), pl.cdiv(V, MAX_ROW_TILE))
    tq = Q if n == 1 else _round_up(pl.cdiv(Q, n), 8)
    tv = V if n == 1 else _round_up(pl.cdiv(V, n), 8)
    nq, nv = pl.cdiv(Q, tq), pl.cdiv(V, tv)
    if nq == nv:
        n = nq
        qmap = lambda i: (i, 0)
        vmap = lambda i: (i, 0)
        sem = ("parallel",)
    else:
        # Uneven split fallback: clamped tail blocks are revisited (idempotent), so the axis
        # must stay sequential to avoid cross-core write races on v7x.
        n = max(nq, nv)
        qmap = lambda i: (jnp.minimum(i, nq - 1), 0)
        vmap = lambda i: (jnp.minimum(i, nv - 1), 0)
        sem = ("arbitrary",)
    wmap = lambda i: (0, 0)

    w_specs = [
        pl.BlockSpec((D, H), wmap), pl.BlockSpec((1, H), wmap),
        pl.BlockSpec((H, D), wmap), pl.BlockSpec((1, D), wmap),
        pl.BlockSpec((D, H), wmap), pl.BlockSpec((1, H), wmap),
        pl.BlockSpec((H, D), wmap), pl.BlockSpec((1, D), wmap),
        pl.BlockSpec((D, D), wmap), pl.BlockSpec((1, D), wmap),
        pl.BlockSpec((D, D), wmap), pl.BlockSpec((1, D), wmap),
    ]
    kernel = functools.partial(_encoder_kernel, compute_dtype=compute_dtype)
    return pl.pallas_call(
        kernel,
        grid=(n,),
        in_specs=[pl.BlockSpec((tq, D), qmap),
                  pl.BlockSpec((tv, D), vmap),
                  pl.BlockSpec((tv, D), vmap)] + w_specs,
        out_specs=(pl.BlockSpec((tq, D), qmap), pl.BlockSpec((tv, D), vmap)),
        out_shape=(jax.ShapeDtypeStruct((Q, D), jnp.float32),
                   jax.ShapeDtypeStruct((V, D), jnp.float32)),
        compiler_params=pltpu.CompilerParams(
            dimension_semantics=sem,
            vmem_limit_bytes=_vmem_limit_bytes()),
    )(q_pe, v_pe, ctr_feat,
      p['q_w1'], p['q_b1'].reshape(1, H), p['q_w2'], p['q_b2'].reshape(1, D),
      p['v_w1'], p['v_b1'].reshape(1, H), p['v_w2'], p['v_b2'].reshape(1, D),
      p['se_wr'], p['se_br'].reshape(1, D), p['se_we'], p['se_be'].reshape(1, D))


def nbr_attn_pallas(qpos_emb, vpos_emb, ctr_feat, v_inds2d, compute_dtype):
    Q, D = qpos_emb.shape
    V = vpos_emb.shape[0]
    N = v_inds2d.shape[1]

    # >=2 grid steps whenever Q allows it, so both v7x TensorCores get work; tile capped at
    # MAX_ROW_TILE to keep the double-buffered (tq, D)/(tq, N) blocks small.
    tq = Q if Q < 16 else min(MAX_ROW_TILE, _round_up(pl.cdiv(Q, 2), 8))
    grid = (pl.cdiv(Q, tq),)
    tbl_map = lambda i: (0, 0)     # tables stay resident in VMEM (fetched once)
    # TODO(synk): for very large V (tables no longer fitting VMEM, esp. v7x's 64 MiB) switch
    # to memory_space=pl.ANY tables + scalar-prefetched indices + manual make_async_copy
    # row-gather (P4); the VMEM-resident one-hot formulation here assumes modest V.
    kernel = functools.partial(_nbr_attn_kernel, compute_dtype=compute_dtype)
    return pl.pallas_call(
        kernel,
        grid=grid,
        in_specs=[pl.BlockSpec((tq, N), lambda i: (i, 0)),
                  pl.BlockSpec((tq, D), lambda i: (i, 0)),
                  pl.BlockSpec((V, D), tbl_map),
                  pl.BlockSpec((V, D), tbl_map)],
        out_specs=pl.BlockSpec((tq, D), lambda i: (i, 0)),
        out_shape=jax.ShapeDtypeStruct((Q, D), jnp.float32),
        compiler_params=pltpu.CompilerParams(
            dimension_semantics=("parallel",),
            vmem_limit_bytes=_vmem_limit_bytes()),
    )(v_inds2d, qpos_emb, vpos_emb, ctr_feat)


# ------------------------------------------------------------------------------------------
# Pure-JAX reference path (correctness check only — matches the PyTorch module semantics)
# ------------------------------------------------------------------------------------------
def mlp2_jnp(x, w1, b1, w2, b2):
    return jnp.maximum(x @ w1 + b1, 0.0) @ w2 + b2


def se_gate_jnp(x, feat, wr, br, we, be):
    return x * jax.nn.sigmoid(jnp.maximum(feat @ wr + br, 0.0) @ we + be)


def nbr_attn_jnp(qpos_emb, vpos_emb, ctr_feat, v_inds2d):
    # Mirrors the PyTorch reference: zero padding row for invalid (-1) neighbours.
    vpad = jnp.concatenate([jnp.zeros_like(vpos_emb[:1]), vpos_emb], axis=0)
    fpad = jnp.concatenate([jnp.zeros_like(ctr_feat[:1]), ctr_feat], axis=0)
    idx = v_inds2d + 1
    v3 = vpad[idx]                                        # (Q, N, D)
    f3 = fpad[idx]
    s = jnp.sum(qpos_emb[:, None, :] * v3, axis=-1) / SQRT_DIM
    a = jax.nn.softmax(s, axis=-1)
    return jnp.sum(a[..., None] * f3, axis=1)


# ------------------------------------------------------------------------------------------
# Plain-JAX glue (coordinate transforms, positional embedding, neighbor index mapping)
# ------------------------------------------------------------------------------------------
def pos2posemb2d(pos, num_pos_feats=NUM_POS_FEAT, temperature=10000.0):
    scale = 2.0 * math.pi
    pos = pos * scale
    dim_t = jnp.arange(num_pos_feats, dtype=jnp.float32)
    dim_t = temperature ** (2.0 * jnp.floor(dim_t / 2.0) / num_pos_feats)
    pos_x = pos[..., 0, None] / dim_t
    pos_y = pos[..., 1, None] / dim_t
    pos_x = jnp.stack((jnp.sin(pos_x[..., 0::2]), jnp.cos(pos_x[..., 1::2])),
                      axis=-1).reshape(pos.shape[:-1] + (-1,))
    pos_y = jnp.stack((jnp.sin(pos_y[..., 0::2]), jnp.cos(pos_y[..., 1::2])),
                      axis=-1).reshape(pos.shape[:-1] + (-1,))
    return jnp.concatenate((pos_y, pos_x), axis=-1)


def indices2metric(indices, vs):
    coor = indices.astype(jnp.float32)
    coor = coor.at[:, 1].set((coor[:, 1] + 0.5) * vs[0])
    coor = coor.at[:, 2].set((coor[:, 2] + 0.5) * vs[1])
    return coor


def metric2indices(coor, vs):
    ind = coor.astype(jnp.float32)
    ind = ind.at[:, 1].set(ind[:, 1] / vs[0])
    ind = ind.at[:, 2].set(ind[:, 2] / vs[1])
    return jnp.floor(ind).astype(jnp.int32)


def coor_to_indices(coor):
    ind = coor.astype(jnp.float32)
    ind = ind.at[:, 1].set(ind[:, 1] / STRIDE - OFFSET_SZ_X)
    ind = ind.at[:, 2].set(ind[:, 2] / STRIDE - OFFSET_SZ_Y)
    return ind.astype(jnp.int32)


def get_nbr_mapping(query_pos, value_pos, batch_size):
    """Returns (Q, N_NBRS) int32 value-row indices, -1 for neighbours with no value row.

    The value_map scatter stays in plain JAX/XLA (index bookkeeping, not kernel work).
    No traced assert / host sync: out-of-range neighbours simply map to -1.
    """
    query_pos = query_pos.at[:, 1:].add(PAD)
    value_pos = value_pos.at[:, 1:].add(PAD)
    Q = query_pos.shape[0]
    V = value_pos.shape[0]
    value_map = -jnp.ones((batch_size, SIZE_X + 2 * PAD, SIZE_Y + 2 * PAD), jnp.int32)
    value_map = value_map.at[value_pos[:, 0], value_pos[:, 1], value_pos[:, 2]].set(
        jnp.arange(V, dtype=jnp.int32))
    nbrs = jnp.stack(jnp.meshgrid(jnp.arange(-1, 2), jnp.arange(-1, 2), indexing='ij'),
                     axis=-1).reshape(-1, 2)
    q_nbr = jnp.repeat(query_pos[:, None, :], N_NBRS, axis=1)
    q_nbr = q_nbr.at[..., 1:].add(nbrs[None])
    q_nbr = q_nbr.reshape(-1, 3)
    mask = (jnp.all(q_nbr >= 0, axis=-1)
            & (q_nbr[:, 1] < SIZE_X + 2 * PAD)
            & (q_nbr[:, 2] < SIZE_Y + 2 * PAD))
    v_looked = value_map[q_nbr[:, 0], q_nbr[:, 1], q_nbr[:, 2]]
    v_inds = jnp.where(mask, v_looked, -1)
    return v_inds.reshape(Q, N_NBRS)


def neighborhood_attention_forward(params, ref_pts, ctr_coor, ctr_feat, batch_size,
                                   use_pallas=True, compute_dtype=jnp.bfloat16):
    lr = jnp.asarray(LIDAR_RANGE)
    vs = jnp.asarray(VOXEL_SIZE)

    ctr_pts = indices2metric(ctr_coor, vs)
    ctr_inds = coor_to_indices(ctr_coor)
    ref_coor = metric2indices(ref_pts, vs)
    ref_inds = coor_to_indices(ref_coor)

    query_pos = (ref_pts[:, 1:3] - lr[0:2]) / (lr[3:5] - lr[0:2])
    value_pos = (ctr_pts[:, 1:3] - lr[0:2]) / (lr[3:5] - lr[0:2])

    q_pe = pos2posemb2d(query_pos)
    v_pe = pos2posemb2d(value_pos)

    if use_pallas:
        qpos_emb, vpos_emb = fused_pos_encoder_pallas(q_pe, v_pe, ctr_feat, params,
                                                      compute_dtype)
    else:
        qpos_emb = mlp2_jnp(q_pe, params['q_w1'], params['q_b1'],
                            params['q_w2'], params['q_b2'])
        vpos_emb = mlp2_jnp(v_pe, params['v_w1'], params['v_b1'],
                            params['v_w2'], params['v_b2'])
        vpos_emb = se_gate_jnp(vpos_emb, ctr_feat, params['se_wr'], params['se_br'],
                               params['se_we'], params['se_be'])

    v_inds2d = get_nbr_mapping(ref_inds, ctr_inds, batch_size)

    if use_pallas:
        # No padded-table concatenates and no (Q, 9*D) gathered tensors: the attention kernel
        # gathers neighbour rows itself from VMEM-resident tables.
        return nbr_attn_pallas(qpos_emb, vpos_emb, ctr_feat, v_inds2d, compute_dtype)
    return nbr_attn_jnp(qpos_emb, vpos_emb, ctr_feat, v_inds2d)


# ------------------------------------------------------------------------------------------
# Main: deterministic synthetic data + parameters, run Pallas forward, verify vs pure JAX.
# ------------------------------------------------------------------------------------------
if __name__ == "__main__":
    key = jax.random.PRNGKey(0)
    k = jax.random.split(key, 12)

    Qh, Vh = 8, 12          # queries / voxels per batch
    Q, V = 2 * Qh, 2 * Vh   # Q=16, V=24
    D = EMB_DIM
    B = 2                   # static batch size (no device->host max() round trip)

    # ctr_coor: distinct voxel indices (batch, x, y) with x,y in [-8, 7]
    cells0 = jax.random.choice(k[0], SIZE_X * SIZE_Y, (Vh,), replace=False)
    cells1 = jax.random.choice(k[1], SIZE_X * SIZE_Y, (Vh,), replace=False)

    def cells_to_coor(cells, b):
        x = (cells // SIZE_Y).astype(jnp.int32) + OFFSET_SZ_X
        y = (cells % SIZE_Y).astype(jnp.int32) + OFFSET_SZ_Y
        bcol = jnp.full((cells.shape[0],), b, jnp.int32)
        return jnp.stack([bcol, x, y], axis=-1)

    ctr_coor = jnp.concatenate([cells_to_coor(cells0, 0), cells_to_coor(cells1, 1)], axis=0)

    # ref_pts: metric query points at voxel centers (batch_idx, x, y)
    qc0 = jax.random.randint(k[2], (Qh, 2), 0, SIZE_X)
    qc1 = jax.random.randint(k[3], (Qh, 2), 0, SIZE_X)

    def cells_to_pts(qc, b):
        xy = qc.astype(jnp.float32) + jnp.array([OFFSET_SZ_X, OFFSET_SZ_Y], jnp.float32) + 0.5
        bcol = jnp.full((qc.shape[0], 1), float(b), jnp.float32)
        return jnp.concatenate([bcol, xy], axis=-1)

    ref_pts = jnp.concatenate([cells_to_pts(qc0, 0), cells_to_pts(qc1, 1)], axis=0)

    ctr_feat = jax.random.normal(k[4], (V, D), jnp.float32) * 0.5

    def lin(kk, fan_in, fan_out):
        return jax.random.normal(kk, (fan_in, fan_out), jnp.float32) / np.sqrt(fan_in)

    params = {
        'q_w1': lin(k[5], D, 2 * D), 'q_b1': jnp.zeros((2 * D,), jnp.float32) + 0.01,
        'q_w2': lin(k[6], 2 * D, D), 'q_b2': jnp.zeros((D,), jnp.float32) - 0.01,
        'v_w1': lin(k[7], D, 2 * D), 'v_b1': jnp.zeros((2 * D,), jnp.float32) + 0.02,
        'v_w2': lin(k[8], 2 * D, D), 'v_b2': jnp.zeros((D,), jnp.float32) - 0.02,
        'se_wr': lin(k[9], D, D), 'se_br': jnp.zeros((D,), jnp.float32) + 0.03,
        'se_we': lin(k[10], D, D), 'se_be': jnp.zeros((D,), jnp.float32) - 0.03,
    }

    fwd = jax.jit(neighborhood_attention_forward,
                  static_argnames=("batch_size", "use_pallas", "compute_dtype"))

    # Performance path: bf16 MXU operands, f32 accumulation/elementwise.
    out_bf16 = fwd(params, ref_pts, ctr_coor, ctr_feat, batch_size=B,
                   use_pallas=True, compute_dtype=jnp.bfloat16)
    out_bf16 = jax.block_until_ready(out_bf16)

    # f32 MXU path (tight numerical check against the reference semantics).
    out_f32 = fwd(params, ref_pts, ctr_coor, ctr_feat, batch_size=B,
                  use_pallas=True, compute_dtype=jnp.float32)
    out_f32 = jax.block_until_ready(out_f32)

    ref = fwd(params, ref_pts, ctr_coor, ctr_feat, batch_size=B,
              use_pallas=False, compute_dtype=jnp.float32)
    ref = jax.block_until_ready(ref)

    assert out_bf16.shape == (Q, D), out_bf16.shape
    assert out_f32.shape == (Q, D), out_f32.shape
    np.testing.assert_allclose(np.asarray(out_f32), np.asarray(ref), rtol=1e-2, atol=1e-2)
    # bf16 MXU operands introduce ~0.5-1% rounding per dot; looser tolerance for that path.
    np.testing.assert_allclose(np.asarray(out_bf16), np.asarray(ref), rtol=5e-2, atol=5e-2)
    print("KERNEL_OK")
</pallas_src>

<mosaic_0001>
module attributes {stable_mosaic.version = 11 : i64} {
  func.func @_encoder_kernel(%arg0: i32, %arg1: memref<16x32xf32, #tpu.memory_space<vmem>>, %arg2: memref<24x32xf32, #tpu.memory_space<vmem>>, %arg3: memref<24x32xf32, #tpu.memory_space<vmem>>, %arg4: memref<32x64xf32, #tpu.memory_space<vmem>>, %arg5: memref<1x64xf32, #tpu.memory_space<vmem>>, %arg6: memref<64x32xf32, #tpu.memory_space<vmem>>, %arg7: memref<1x32xf32, #tpu.memory_space<vmem>>, %arg8: memref<32x64xf32, #tpu.memory_space<vmem>>, %arg9: memref<1x64xf32, #tpu.memory_space<vmem>>, %arg10: memref<64x32xf32, #tpu.memory_space<vmem>>, %arg11: memref<1x32xf32, #tpu.memory_space<vmem>>, %arg12: memref<32x32xf32, #tpu.memory_space<vmem>>, %arg13: memref<1x32xf32, #tpu.memory_space<vmem>>, %arg14: memref<32x32xf32, #tpu.memory_space<vmem>>, %arg15: memref<1x32xf32, #tpu.memory_space<vmem>>, %arg16: memref<16x32xf32, #tpu.memory_space<vmem>>, %arg17: memref<24x32xf32, #tpu.memory_space<vmem>>) attributes {dimension_semantics = [#tpu.dimension_semantics<parallel>], iteration_bounds = array<i64: 1>, scalar_prefetch = 0 : i64, scratch_operands = 0 : i64, tpu.core_type = #tpu.core_type<tc>, window_params = [{transform_indices = @transform_0, window_bounds = array<i64: 16, 32>}, {transform_indices = @transform_1, window_bounds = array<i64: 24, 32>}, {transform_indices = @transform_2, window_bounds = array<i64: 24, 32>}, {pipeline_mode = #tpu.pipeline_mode<synchronous>, transform_indices = @transform_3, window_bounds = array<i64: 32, 64>}, {pipeline_mode = #tpu.pipeline_mode<synchronous>, transform_indices = @transform_4, window_bounds = array<i64: 1, 64>}, {pipeline_mode = #tpu.pipeline_mode<synchronous>, transform_indices = @transform_5, window_bounds = array<i64: 64, 32>}, {pipeline_mode = #tpu.pipeline_mode<synchronous>, transform_indices = @transform_6, window_bounds = array<i64: 1, 32>}, {pipeline_mode = #tpu.pipeline_mode<synchronous>, transform_indices = @transform_7, window_bounds = array<i64: 32, 64>}, {pipeline_mode = #tpu.pipeline_mode<synchronous>, transform_indices = @transform_8, window_bounds = array<i64: 1, 64>}, {pipeline_mode = #tpu.pipeline_mode<synchronous>, transform_indices = @transform_9, window_bounds = array<i64: 64, 32>}, {pipeline_mode = #tpu.pipeline_mode<synchronous>, transform_indices = @transform_10, window_bounds = array<i64: 1, 32>}, {pipeline_mode = #tpu.pipeline_mode<synchronous>, transform_indices = @transform_11, window_bounds = array<i64: 32, 32>}, {pipeline_mode = #tpu.pipeline_mode<synchronous>, transform_indices = @transform_12, window_bounds = array<i64: 1, 32>}, {pipeline_mode = #tpu.pipeline_mode<synchronous>, transform_indices = @transform_13, window_bounds = array<i64: 32, 32>}, {pipeline_mode = #tpu.pipeline_mode<synchronous>, transform_indices = @transform_14, window_bounds = array<i64: 1, 32>}, {transform_indices = @transform_15, window_bounds = array<i64: 16, 32>}, {transform_indices = @transform_16, window_bounds = array<i64: 24, 32>}]} {
    %c0 = arith.constant 0 : index
    %c0_0 = arith.constant 0 : index
    %0 = vector.load %arg1[%c0, %c0_0] : memref<16x32xf32, #tpu.memory_space<vmem>>, vector<16x32xf32>
    %1 = arith.truncf %0 : vector<16x32xf32> to vector<16x32xbf16>
    %c0_1 = arith.constant 0 : index
    %c0_2 = arith.constant 0 : index
    %2 = vector.load %arg4[%c0_1, %c0_2] : memref<32x64xf32, #tpu.memory_space<vmem>>, vector<32x64xf32>
    %3 = arith.truncf %2 : vector<32x64xf32> to vector<32x64xbf16>
    %cst = arith.constant dense<0.000000e+00> : vector<16x64xf32>
    %4 = tpu.matmul %1, %3, %cst {dimension_numbers = #tpu.dot_dimension_numbers<[1], [0], [0], [1], [0, 0, 1, 1], [], []>} : vector<16x32xbf16>, vector<32x64xbf16>, vector<16x64xf32> -> vector<16x64xf32>
    %c0_3 = arith.constant 0 : index
    %c0_4 = arith.constant 0 : index
    %5 = vector.load %arg5[%c0_3, %c0_4] : memref<1x64xf32, #tpu.memory_space<vmem>>, vector<1x64xf32>
    %6 = vector.broadcast %5 : vector<1x64xf32> to vector<16x64xf32>
    %7 = arith.addf %4, %6 : vector<16x64xf32>
    %cst_5 = arith.constant 0.000000e+00 : f32
    %8 = vector.broadcast %cst_5 : f32 to vector<16x64xf32>
    %9 = arith.maximumf %7, %8 : vector<16x64xf32>
    %10 = arith.truncf %9 : vector<16x64xf32> to vector<16x64xbf16>
    %c0_6 = arith.constant 0 : index
    %c0_7 = arith.constant 0 : index
    %11 = vector.load %arg6[%c0_6, %c0_7] : memref<64x32xf32, #tpu.memory_space<vmem>>, vector<64x32xf32>
    %12 = arith.truncf %11 : vector<64x32xf32> to vector<64x32xbf16>
    %cst_8 = arith.constant dense<0.000000e+00> : vector<16x32xf32>
    %13 = tpu.matmul %10, %12, %cst_8 {dimension_numbers = #tpu.dot_dimension_numbers<[1], [0], [0], [1], [0, 0, 1, 1], [], []>} : vector<16x64xbf16>, vector<64x32xbf16>, vector<16x32xf32> -> vector<16x32xf32>
    %c0_9 = arith.constant 0 : index
    %c0_10 = arith.constant 0 : index
    %14 = vector.load %arg7[%c0_9, %c0_10] : memref<1x32xf32, #tpu.memory_space<vmem>>, vector<1x32xf32>
    %15 = vector.broadcast %14 : vector<1x32xf32> to vector<16x32xf32>
    %16 = arith.addf %13, %15 : vector<16x32xf32>
    %c0_11 = arith.constant 0 : index
    %c0_12 = arith.constant 0 : index
    %17 = vector.load %arg16[%c0_11, %c0_12] : memref<16x32xf32, #tpu.memory_space<vmem>>, vector<16x32xf32>
    tpu.vector_store %arg16[%c0_11, %c0_12], %16 {strides = array<i32>} : memref<16x32xf32, #tpu.memory_space<vmem>>, vector<16x32xf32>,
    %c0_13 = arith.constant 0 : index
    %c0_14 = arith.constant 0 : index
    %18 = vector.load %arg2[%c0_13, %c0_14] : memref<24x32xf32, #tpu.memory_space<vmem>>, vector<24x32xf32>
    %19 = arith.truncf %18 : vector<24x32xf32> to vector<24x32xbf16>
    %c0_15 = arith.constant 0 : index
    %c0_16 = arith.constant 0 : index
    %20 = vector.load %arg8[%c0_15, %c0_16] : memref<32x64xf32, #tpu.memory_space<vmem>>, vector<32x64xf32>
    %21 = arith.truncf %20 : vector<32x64xf32> to vector<32x64xbf16>
    %cst_17 = arith.constant dense<0.000000e+00> : vector<24x64xf32>
    %22 = tpu.matmul %19, %21, %cst_17 {dimension_numbers = #tpu.dot_dimension_numbers<[1], [0], [0], [1], [0, 0, 1, 1], [], []>} : vector<24x32xbf16>, vector<32x64xbf16>, vector<24x64xf32> -> vector<24x64xf32>
    %c0_18 = arith.constant 0 : index
    %c0_19 = arith.constant 0 : index
    %23 = vector.load %arg9[%c0_18, %c0_19] : memref<1x64xf32, #tpu.memory_space<vmem>>, vector<1x64xf32>
    %24 = vector.broadcast %23 : vector<1x64xf32> to vector<24x64xf32>
    %25 = arith.addf %22, %24 : vector<24x64xf32>
    %cst_20 = arith.constant 0.000000e+00 : f32
    %26 = vector.broadcast %cst_20 : f32 to vector<24x64xf32>
    %27 = arith.maximumf %25, %26 : vector<24x64xf32>
    %28 = arith.truncf %27 : vector<24x64xf32> to vector<24x64xbf16>
    %c0_21 = arith.constant 0 : index
    %c0_22 = arith.constant 0 : index
    %29 = vector.load %arg10[%c0_21, %c0_22] : memref<64x32xf32, #tpu.memory_space<vmem>>, vector<64x32xf32>
    %30 = arith.truncf %29 : vector<64x32xf32> to vector<64x32xbf16>
    %cst_23 = arith.constant dense<0.000000e+00> : vector<24x32xf32>
    %31 = tpu.matmul %28, %30, %cst_23 {dimension_numbers = #tpu.dot_dimension_numbers<[1], [0], [0], [1], [0, 0, 1, 1], [], []>} : vector<24x64xbf16>, vector<64x32xbf16>, vector<24x32xf32> -> vector<24x32xf32>
    %c0_24 = arith.constant 0 : index
    %c0_25 = arith.constant 0 : index
    %32 = vector.load %arg11[%c0_24, %c0_25] : memref<1x32xf32, #tpu.memory_space<vmem>>, vector<1x32xf32>
    %33 = vector.broadcast %32 : vector<1x32xf32> to vector<24x32xf32>
    %34 = arith.addf %31, %33 : vector<24x32xf32>
    %c0_26 = arith.constant 0 : index
    %c0_27 = arith.constant 0 : index
    %35 = vector.load %arg3[%c0_26, %c0_27] : memref<24x32xf32, #tpu.memory_space<vmem>>, vector<24x32xf32>
    %36 = arith.truncf %35 : vector<24x32xf32> to vector<24x32xbf16>
    %c0_28 = arith.constant 0 : index
    %c0_29 = arith.constant 0 : index
    %37 = vector.load %arg12[%c0_28, %c0_29] : memref<32x32xf32, #tpu.memory_space<vmem>>, vector<32x32xf32>
    %38 = arith.truncf %37 : vector<32x32xf32> to vector<32x32xbf16>
    %cst_30 = arith.constant dense<0.000000e+00> : vector<24x32xf32>
    %39 = tpu.matmul %36, %38, %cst_30 {dimension_numbers = #tpu.dot_dimension_numbers<[1], [0], [0], [1], [0, 0, 1, 1], [], []>} : vector<24x32xbf16>, vector<32x32xbf16>, vector<24x32xf32> -> vector<24x32xf32>
    %c0_31 = arith.constant 0 : index
    %c0_32 = arith.constant 0 : index
    %40 = vector.load %arg13[%c0_31, %c0_32] : memref<1x32xf32, #tpu.memory_space<vmem>>, vector<1x32xf32>
    %41 = vector.broadcast %40 : vector<1x32xf32> to vector<24x32xf32>
    %42 = arith.addf %39, %41 : vector<24x32xf32>
    %cst_33 = arith.constant 0.000000e+00 : f32
    %43 = vector.broadcast %cst_33 : f32 to vector<24x32xf32>
    %44 = arith.maximumf %42, %43 : vector<24x32xf32>
    %45 = arith.truncf %44 : vector<24x32xf32> to vector<24x32xbf16>
    %c0_34 = arith.constant 0 : index
    %c0_35 = arith.constant 0 : index
    %46 = vector.load %arg14[%c0_34, %c0_35] : memref<32x32xf32, #tpu.memory_space<vmem>>, vector<32x32xf32>
    %47 = arith.truncf %46 : vector<32x32xf32> to vector<32x32xbf16>
    %cst_36 = arith.constant dense<0.000000e+00> : vector<24x32xf32>
    %48 = tpu.matmul %45, %47, %cst_36 {dimension_numbers = #tpu.dot_dimension_numbers<[1], [0], [0], [1], [0, 0, 1, 1], [], []>} : vector<24x32xbf16>, vector<32x32xbf16>, vector<24x32xf32> -> vector<24x32xf32>
    %c0_37 = arith.constant 0 : index
    %c0_38 = arith.constant 0 : index
    %49 = vector.load %arg15[%c0_37, %c0_38] : memref<1x32xf32, #tpu.memory_space<vmem>>, vector<1x32xf32>
    %50 = vector.broadcast %49 : vector<1x32xf32> to vector<24x32xf32>
    %51 = arith.addf %48, %50 : vector<24x32xf32>
    %52 = arith.negf %51 : vector<24x32xf32>
    %53 = math.exp %52 : vector<24x32xf32>
    %cst_39 = arith.constant 1.000000e+00 : f32
    %54 = vector.broadcast %cst_39 : f32 to vector<24x32xf32>
    %55 = arith.addf %54, %53 : vector<24x32xf32>
    %56 = arith.divf %54, %55 : vector<24x32xf32>
    %57 = arith.mulf %34, %56 : vector<24x32xf32>
    %c0_40 = arith.constant 0 : index
    %c0_41 = arith.constant 0 : index
    %58 = vector.load %arg17[%c0_40, %c0_41] : memref<24x32xf32, #tpu.memory_space<vmem>>, vector<24x32xf32>
    tpu.vector_store %arg17[%c0_40, %c0_41], %57 {strides = array<i32>} : memref<24x32xf32, #tpu.memory_space<vmem>>, vector<24x32xf32>,
    return
  }
  func.func @transform_0(%arg0: i32) -> (i32, i32) {
    %c0_i32 = arith.constant 0 : i32
    %c0_i32_0 = arith.constant 0 : i32
    return %arg0, %c0_i32 : i32, i32
  }
  func.func @transform_1(%arg0: i32) -> (i32, i32) {
    %c0_i32 = arith.constant 0 : i32
    %c0_i32_0 = arith.constant 0 : i32
    return %arg0, %c0_i32 : i32, i32
  }
  func.func @transform_2(%arg0: i32) -> (i32, i32) {
    %c0_i32 = arith.constant 0 : i32
    %c0_i32_0 = arith.constant 0 : i32
    return %arg0, %c0_i32 : i32, i32
  }
  func.func @transform_3(%arg0: i32) -> (i32, i32) {
    %c0_i32 = arith.constant 0 : i32
    %c0_i32_0 = arith.constant 0 : i32
    %c0_i32_1 = arith.constant 0 : i32
    return %c0_i32, %c0_i32_0 : i32, i32
  }
  func.func @transform_4(%arg0: i32) -> (i32, i32) {
    %c0_i32 = arith.constant 0 : i32
    %c0_i32_0 = arith.constant 0 : i32
    %c0_i32_1 = arith.constant 0 : i32
    return %c0_i32, %c0_i32_0 : i32, i32
  }
  func.func @transform_5(%arg0: i32) -> (i32, i32) {
    %c0_i32 = arith.constant 0 : i32
    %c0_i32_0 = arith.constant 0 : i32
    %c0_i32_1 = arith.constant 0 : i32
    return %c0_i32, %c0_i32_0 : i32, i32
  }
  func.func @transform_6(%arg0: i32) -> (i32, i32) {
    %c0_i32 = arith.constant 0 : i32
    %c0_i32_0 = arith.constant 0 : i32
    %c0_i32_1 = arith.constant 0 : i32
    return %c0_i32, %c0_i32_0 : i32, i32
  }
  func.func @transform_7(%arg0: i32) -> (i32, i32) {
    %c0_i32 = arith.constant 0 : i32
    %c0_i32_0 = arith.constant 0 : i32
    %c0_i32_1 = arith.constant 0 : i32
    return %c0_i32, %c0_i32_0 : i32, i32
  }
  func.func @transform_8(%arg0: i32) -> (i32, i32) {
    %c0_i32 = arith.constant 0 : i32
    %c0_i32_0 = arith.constant 0 : i32
    %c0_i32_1 = arith.constant 0 : i32
    return %c0_i32, %c0_i32_0 : i32, i32
  }
  func.func @transform_9(%arg0: i32) -> (i32, i32) {
    %c0_i32 = arith.constant 0 : i32
    %c0_i32_0 = arith.constant 0 : i32
    %c0_i32_1 = arith.constant 0 : i32
    return %c0_i32, %c0_i32_0 : i32, i32
  }
  func.func @transform_10(%arg0: i32) -> (i32, i32) {
    %c0_i32 = arith.constant 0 : i32
    %c0_i32_0 = arith.constant 0 : i32
    %c0_i32_1 = arith.constant 0 : i32
    return %c0_i32, %c0_i32_0 : i32, i32
  }
  func.func @transform_11(%arg0: i32) -> (i32, i32) {
    %c0_i32 = arith.constant 0 : i32
    %c0_i32_0 = arith.constant 0 : i32
    %c0_i32_1 = arith.constant 0 : i32
    return %c0_i32, %c0_i32_0 : i32, i32
  }
  func.func @transform_12(%arg0: i32) -> (i32, i32) {
    %c0_i32 = arith.constant 0 : i32
    %c0_i32_0 = arith.constant 0 : i32
    %c0_i32_1 = arith.constant 0 : i32
    return %c0_i32, %c0_i32_0 : i32, i32
  }
  func.func @transform_13(%arg0: i32) -> (i32, i32) {
    %c0_i32 = arith.constant 0 : i32
    %c0_i32_0 = arith.constant 0 : i32
    %c0_i32_1 = arith.constant 0 : i32
    return %c0_i32, %c0_i32_0 : i32, i32
  }
  func.func @transform_14(%arg0: i32) -> (i32, i32) {
    %c0_i32 = arith.constant 0 : i32
    %c0_i32_0 = arith.constant 0 : i32
    %c0_i32_1 = arith.constant 0 : i32
    return %c0_i32, %c0_i32_0 : i32, i32
  }
  func.func @transform_15(%arg0: i32) -> (i32, i32) {
    %c0_i32 = arith.constant 0 : i32
    %c0_i32_0 = arith.constant 0 : i32
    return %arg0, %c0_i32 : i32, i32
  }
  func.func @transform_16(%arg0: i32) -> (i32, i32) {
    %c0_i32 = arith.constant 0 : i32
    %c0_i32_0 = arith.constant 0 : i32
    return %arg0, %c0_i32 : i32, i32
  }
}

module attributes {stable_mosaic.version = 11 : i64} {
  func.func @_nbr_attn_kernel(%arg0: i32, %arg1: memref<8x9xi32, #tpu.memory_space<vmem>>, %arg2: memref<8x32xf32, #tpu.memory_space<vmem>>, %arg3: memref<24x32xf32, #tpu.memory_space<vmem>>, %arg4: memref<24x32xf32, #tpu.memory_space<vmem>>, %arg5: memref<8x32xf32, #tpu.memory_space<vmem>>) attributes {dimension_semantics = [#tpu.dimension_semantics<parallel>], iteration_bounds = array<i64: 2>, scalar_prefetch = 0 : i64, scratch_operands = 0 : i64, tpu.core_type = #tpu.core_type<tc>, window_params = [{transform_indices = @transform_0, window_bounds = array<i64: 8, 9>}, {transform_indices = @transform_1, window_bounds = array<i64: 8, 32>}, {pipeline_mode = #tpu.pipeline_mode<synchronous>, transform_indices = @transform_2, window_bounds = array<i64: 24, 32>}, {pipeline_mode = #tpu.pipeline_mode<synchronous>, transform_indices = @transform_3, window_bounds = array<i64: 24, 32>}, {transform_indices = @transform_4, window_bounds = array<i64: 8, 32>}]} {
    %c0 = arith.constant 0 : index
    %c0_0 = arith.constant 0 : index
    %0 = vector.load %arg2[%c0, %c0_0] : memref<8x32xf32, #tpu.memory_space<vmem>>, vector<8x32xf32>
    %cst = arith.constant 0.176776692 : f32
    %1 = vector.broadcast %cst : f32 to vector<8x32xf32>
    %2 = arith.mulf %0, %1 : vector<8x32xf32>
    %c0_1 = arith.constant 0 : index
    %c0_2 = arith.constant 0 : index
    %3 = vector.load %arg1[%c0_1, %c0_2] : memref<8x9xi32, #tpu.memory_space<vmem>>, vector<8x9xi32>
    %4 = arith.truncf %2 : vector<8x32xf32> to vector<8x32xbf16>
    %c0_3 = arith.constant 0 : index
    %c0_4 = arith.constant 0 : index
    %5 = vector.load %arg3[%c0_3, %c0_4] : memref<24x32xf32, #tpu.memory_space<vmem>>, vector<24x32xf32>
    %6 = arith.truncf %5 : vector<24x32xf32> to vector<24x32xbf16>
    %cst_5 = arith.constant dense<0.000000e+00> : vector<8x24xf32>
    %7 = tpu.matmul %4, %6, %cst_5 {dimension_numbers = #tpu.dot_dimension_numbers<[1], [1], [0], [0], [0, 0, 1, 0], [], []>} : vector<8x32xbf16>, vector<24x32xbf16>, vector<8x24xf32> -> vector<8x24xf32>
    %8 = tpu.iota {dimensions = array<i32: 1>} : vector<8x24xi32>
    %9 = vector.extract_strided_slice %3 {offsets = [0, 0], sizes = [8, 1], strides = [1, 1]} : vector<8x9xi32> to vector<8x1xi32>
    %10 = vector.broadcast %9 : vector<8x1xi32> to vector<8x24xi32>
    %11 = arith.cmpi eq, %8, %10 : vector<8x24xi32>
    %12 = arith.extui %11 : vector<8x24xi1> to vector<8x24xi32>
    %13 = arith.sitofp %12 : vector<8x24xi32> to vector<8x24xf32>
    %14 = vector.extract_strided_slice %3 {offsets = [0, 1], sizes = [8, 1], strides = [1, 1]} : vector<8x9xi32> to vector<8x1xi32>
    %15 = vector.broadcast %14 : vector<8x1xi32> to vector<8x24xi32>
    %16 = arith.cmpi eq, %8, %15 : vector<8x24xi32>
    %17 = arith.extui %16 : vector<8x24xi1> to vector<8x24xi32>
    %18 = arith.sitofp %17 : vector<8x24xi32> to vector<8x24xf32>
    %19 = vector.extract_strided_slice %3 {offsets = [0, 2], sizes = [8, 1], strides = [1, 1]} : vector<8x9xi32> to vector<8x1xi32>
    %20 = vector.broadcast %19 : vector<8x1xi32> to vector<8x24xi32>
    %21 = arith.cmpi eq, %8, %20 : vector<8x24xi32>
    %22 = arith.extui %21 : vector<8x24xi1> to vector<8x24xi32>
    %23 = arith.sitofp %22 : vector<8x24xi32> to vector<8x24xf32>
    %24 = vector.extract_strided_slice %3 {offsets = [0, 3], sizes = [8, 1], strides = [1, 1]} : vector<8x9xi32> to vector<8x1xi32>
    %25 = vector.broadcast %24 : vector<8x1xi32> to vector<8x24xi32>
    %26 = arith.cmpi eq, %8, %25 : vector<8x24xi32>
    %27 = arith.extui %26 : vector<8x24xi1> to vector<8x24xi32>
    %28 = arith.sitofp %27 : vector<8x24xi32> to vector<8x24xf32>
    %29 = vector.extract_strided_slice %3 {offsets = [0, 4], sizes = [8, 1], strides = [1, 1]} : vector<8x9xi32> to vector<8x1xi32>
    %30 = vector.broadcast %29 : vector<8x1xi32> to vector<8x24xi32>
    %31 = arith.cmpi eq, %8, %30 : vector<8x24xi32>
    %32 = arith.extui %31 : vector<8x24xi1> to vector<8x24xi32>
    %33 = arith.sitofp %32 : vector<8x24xi32> to vector<8x24xf32>
    %34 = vector.extract_strided_slice %3 {offsets = [0, 5], sizes = [8, 1], strides = [1, 1]} : vector<8x9xi32> to vector<8x1xi32>
    %35 = vector.broadcast %34 : vector<8x1xi32> to vector<8x24xi32>
    %36 = arith.cmpi eq, %8, %35 : vector<8x24xi32>
    %37 = arith.extui %36 : vector<8x24xi1> to vector<8x24xi32>
    %38 = arith.sitofp %37 : vector<8x24xi32> to vector<8x24xf32>
    %39 = vector.extract_strided_slice %3 {offsets = [0, 6], sizes = [8, 1], strides = [1, 1]} : vector<8x9xi32> to vector<8x1xi32>
    %40 = vector.broadcast %39 : vector<8x1xi32> to vector<8x24xi32>
    %41 = arith.cmpi eq, %8, %40 : vector<8x24xi32>
    %42 = arith.extui %41 : vector<8x24xi1> to vector<8x24xi32>
    %43 = arith.sitofp %42 : vector<8x24xi32> to vector<8x24xf32>
    %44 = vector.extract_strided_slice %3 {offsets = [0, 7], sizes = [8, 1], strides = [1, 1]} : vector<8x9xi32> to vector<8x1xi32>
    %45 = vector.broadcast %44 : vector<8x1xi32> to vector<8x24xi32>
    %46 = arith.cmpi eq, %8, %45 : vector<8x24xi32>
    %47 = arith.extui %46 : vector<8x24xi1> to vector<8x24xi32>
    %48 = arith.sitofp %47 : vector<8x24xi32> to vector<8x24xf32>
    %49 = vector.extract_strided_slice %3 {offsets = [0, 8], sizes = [8, 1], strides = [1, 1]} : vector<8x9xi32> to vector<8x1xi32>
    %50 = vector.broadcast %49 : vector<8x1xi32> to vector<8x24xi32>
    %51 = arith.cmpi eq, %8, %50 : vector<8x24xi32>
    %52 = arith.extui %51 : vector<8x24xi1> to vector<8x24xi32>
    %53 = arith.sitofp %52 : vector<8x24xi32> to vector<8x24xf32>
    %54 = arith.mulf %7, %13 : vector<8x24xf32>
    %cst_6 = arith.constant dense<0.000000e+00> : vector<8xf32>
    %55 = vector.multi_reduction <add>, %54, %cst_6 [1] : vector<8x24xf32> to vector<8xf32>
    %56 = vector.shape_cast %55 : vector<8xf32> to vector<8x1xf32>
    %57 = arith.mulf %7, %18 : vector<8x24xf32>
    %cst_7 = arith.constant dense<0.000000e+00> : vector<8xf32>
    %58 = vector.multi_reduction <add>, %57, %cst_7 [1] : vector<8x24xf32> to vector<8xf32>
    %59 = vector.shape_cast %58 : vector<8xf32> to vector<8x1xf32>
    %60 = arith.mulf %7, %23 : vector<8x24xf32>
    %cst_8 = arith.constant dense<0.000000e+00> : vector<8xf32>
    %61 = vector.multi_reduction <add>, %60, %cst_8 [1] : vector<8x24xf32> to vector<8xf32>
    %62 = vector.shape_cast %61 : vector<8xf32> to vector<8x1xf32>
    %63 = arith.mulf %7, %28 : vector<8x24xf32>
    %cst_9 = arith.constant dense<0.000000e+00> : vector<8xf32>
    %64 = vector.multi_reduction <add>, %63, %cst_9 [1] : vector<8x24xf32> to vector<8xf32>
    %65 = vector.shape_cast %64 : vector<8xf32> to vector<8x1xf32>
    %66 = arith.mulf %7, %33 : vector<8x24xf32>
    %cst_10 = arith.constant dense<0.000000e+00> : vector<8xf32>
    %67 = vector.multi_reduction <add>, %66, %cst_10 [1] : vector<8x24xf32> to vector<8xf32>
    %68 = vector.shape_cast %67 : vector<8xf32> to vector<8x1xf32>
    %69 = arith.mulf %7, %38 : vector<8x24xf32>
    %cst_11 = arith.constant dense<0.000000e+00> : vector<8xf32>
    %70 = vector.multi_reduction <add>, %69, %cst_11 [1] : vector<8x24xf32> to vector<8xf32>
    %71 = vector.shape_cast %70 : vector<8xf32> to vector<8x1xf32>
    %72 = arith.mulf %7, %43 : vector<8x24xf32>
    %cst_12 = arith.constant dense<0.000000e+00> : vector<8xf32>
    %73 = vector.multi_reduction <add>, %72, %cst_12 [1] : vector<8x24xf32> to vector<8xf32>
    %74 = vector.shape_cast %73 : vector<8xf32> to vector<8x1xf32>
    %75 = arith.mulf %7, %48 : vector<8x24xf32>
    %cst_13 = arith.constant dense<0.000000e+00> : vector<8xf32>
    %76 = vector.multi_reduction <add>, %75, %cst_13 [1] : vector<8x24xf32> to vector<8xf32>
    %77 = vector.shape_cast %76 : vector<8xf32> to vector<8x1xf32>
    %78 = arith.mulf %7, %53 : vector<8x24xf32>
    %cst_14 = arith.constant dense<0.000000e+00> : vector<8xf32>
    %79 = vector.multi_reduction <add>, %78, %cst_14 [1] : vector<8x24xf32> to vector<8xf32>
    %80 = vector.shape_cast %79 : vector<8xf32> to vector<8x1xf32>
    %81 = arith.maximumf %56, %59 : vector<8x1xf32>
    %82 = arith.maximumf %81, %62 : vector<8x1xf32>
    %83 = arith.maximumf %82, %65 : vector<8x1xf32>
    %84 = arith.maximumf %83, %68 : vector<8x1xf32>
    %85 = arith.maximumf %84, %71 : vector<8x1xf32>
    %86 = arith.maximumf %85, %74 : vector<8x1xf32>
    %87 = arith.maximumf %86, %77 : vector<8x1xf32>
    %88 = arith.maximumf %87, %80 : vector<8x1xf32>
    %89 = arith.subf %56, %88 : vector<8x1xf32>
    %90 = math.exp %89 : vector<8x1xf32>
    %91 = arith.subf %59, %88 : vector<8x1xf32>
    %92 = math.exp %91 : vector<8x1xf32>
    %93 = arith.subf %62, %88 : vector<8x1xf32>
    %94 = math.exp %93 : vector<8x1xf32>
    %95 = arith.subf %65, %88 : vector<8x1xf32>
    %96 = math.exp %95 : vector<8x1xf32>
    %97 = arith.subf %68, %88 : vector<8x1xf32>
    %98 = math.exp %97 : vector<8x1xf32>
    %99 = arith.subf %71, %88 : vector<8x1xf32>
    %100 = math.exp %99 : vector<8x1xf32>
    %101 = arith.subf %74, %88 : vector<8x1xf32>
    %102 = math.exp %101 : vector<8x1xf32>
    %103 = arith.subf %77, %88 : vector<8x1xf32>
    %104 = math.exp %103 : vector<8x1xf32>
    %105 = arith.subf %80, %88 : vector<8x1xf32>
    %106 = math.exp %105 : vector<8x1xf32>
    %107 = arith.addf %90, %92 : vector<8x1xf32>
    %108 = arith.addf %107, %94 : vector<8x1xf32>
    %109 = arith.addf %108, %96 : vector<8x1xf32>
    %110 = arith.addf %109, %98 : vector<8x1xf32>
    %111 = arith.addf %110, %100 : vector<8x1xf32>
    %112 = arith.addf %111, %102 : vector<8x1xf32>
    %113 = arith.addf %112, %104 : vector<8x1xf32>
    %114 = arith.addf %113, %106 : vector<8x1xf32>
    %115 = tpu.reciprocal %114 {approx = true} : vector<8x1xf32> -> vector<8x1xf32>
    %116 = vector.broadcast %90 : vector<8x1xf32> to vector<8x24xf32>
    %117 = arith.mulf %116, %13 : vector<8x24xf32>
    %118 = vector.broadcast %92 : vector<8x1xf32> to vector<8x24xf32>
    %119 = arith.mulf %118, %18 : vector<8x24xf32>
    %120 = arith.addf %117, %119 : vector<8x24xf32>
    %121 = vector.broadcast %94 : vector<8x1xf32> to vector<8x24xf32>
    %122 = arith.mulf %121, %23 : vector<8x24xf32>
    %123 = arith.addf %120, %122 : vector<8x24xf32>
    %124 = vector.broadcast %96 : vector<8x1xf32> to vector<8x24xf32>
    %125 = arith.mulf %124, %28 : vector<8x24xf32>
    %126 = arith.addf %123, %125 : vector<8x24xf32>
    %127 = vector.broadcast %98 : vector<8x1xf32> to vector<8x24xf32>
    %128 = arith.mulf %127, %33 : vector<8x24xf32>
    %129 = arith.addf %126, %128 : vector<8x24xf32>
    %130 = vector.broadcast %100 : vector<8x1xf32> to vector<8x24xf32>
    %131 = arith.mulf %130, %38 : vector<8x24xf32>
    %132 = arith.addf %129, %131 : vector<8x24xf32>
    %133 = vector.broadcast %102 : vector<8x1xf32> to vector<8x24xf32>
    %134 = arith.mulf %133, %43 : vector<8x24xf32>
    %135 = arith.addf %132, %134 : vector<8x24xf32>
    %136 = vector.broadcast %104 : vector<8x1xf32> to vector<8x24xf32>
    %137 = arith.mulf %136, %48 : vector<8x24xf32>
    %138 = arith.addf %135, %137 : vector<8x24xf32>
    %139 = vector.broadcast %106 : vector<8x1xf32> to vector<8x24xf32>
    %140 = arith.mulf %139, %53 : vector<8x24xf32>
    %141 = arith.addf %138, %140 : vector<8x24xf32>
    %142 = arith.truncf %141 : vector<8x24xf32> to vector<8x24xbf16>
    %c0_15 = arith.constant 0 : index
    %c0_16 = arith.constant 0 : index
    %143 = vector.load %arg4[%c0_15, %c0_16] : memref<24x32xf32, #tpu.memory_space<vmem>>, vector<24x32xf32>
    %144 = arith.truncf %143 : vector<24x32xf32> to vector<24x32xbf16>
    %cst_17 = arith.constant dense<0.000000e+00> : vector<8x32xf32>
    %145 = tpu.matmul %142, %144, %cst_17 {dimension_numbers = #tpu.dot_dimension_numbers<[1], [0], [0], [1], [0, 0, 1, 1], [], []>} : vector<8x24xbf16>, vector<24x32xbf16>, vector<8x32xf32> -> vector<8x32xf32>
    %146 = vector.broadcast %115 : vector<8x1xf32> to vector<8x32xf32>
    %147 = arith.mulf %145, %146 : vector<8x32xf32>
    %c0_18 = arith.constant 0 : index
    %c0_19 = arith.constant 0 : index
    %148 = vector.load %arg5[%c0_18, %c0_19] : memref<8x32xf32, #tpu.memory_space<vmem>>, vector<8x32xf32>
    tpu.vector_store %arg5[%c0_18, %c0_19], %147 {strides = array<i32>} : memref<8x32xf32, #tpu.memory_space<vmem>>, vector<8x32xf32>,
    return
  }
  func.func @transform_0(%arg0: i32) -> (i32, i32) {
    %c0_i32 = arith.constant 0 : i32
    %c0_i32_0 = arith.constant 0 : i32
    return %arg0, %c0_i32 : i32, i32
  }
  func.func @transform_1(%arg0: i32) -> (i32, i32) {
    %c0_i32 = arith.constant 0 : i32
    %c0_i32_0 = arith.constant 0 : i32
    return %arg0, %c0_i32 : i32, i32
  }
  func.func @transform_2(%arg0: i32) -> (i32, i32) {
    %c0_i32 = arith.constant 0 : i32
    %c0_i32_0 = arith.constant 0 : i32
    %c0_i32_1 = arith.constant 0 : i32
    return %c0_i32, %c0_i32_0 : i32, i32
  }
  func.func @transform_3(%arg0: i32) -> (i32, i32) {
    %c0_i32 = arith.constant 0 : i32
    %c0_i32_0 = arith.constant 0 : i32
    %c0_i32_1 = arith.constant 0 : i32
    return %c0_i32, %c0_i32_0 : i32, i32
  }
  func.func @transform_4(%arg0: i32) -> (i32, i32) {
    %c0_i32 = arith.constant 0 : i32
    %c0_i32_0 = arith.constant 0 : i32
    return %arg0, %c0_i32 : i32, i32
  }
}

</mosaic_0001>

<bundles_post_ra>
// kernel: neg.1
= control target key start
LH: loop header
LB: loop body
LE: loop exit
PB: predicated region body
PF: predicated region fallthrough
CT: control target
= control target key end

     0   :  { %s134_s0 = inlined_call_operand.<no memory space> [shape: s32[], index: 0, kind: input, shape index: {}]   ;;  %s135_s1 = inlined_call_operand.vmem [shape: s32[2,20,20], index: 1, kind: output, shape index: {}]  }
   0x1   :  { %v2_v0 = vstv %s134_s0 }
   0x2   :  { %3 = vst [vmem:[%s135_s1] sm:$0x3] %v2_v0  ;;  %42 = vst [vmem:[%s135_s1 + $0x2] sm:$0x3] %v2_v0 }
   0x3   :  { %43 = vst [vmem:[%s135_s1 + $0x4] sm:$0x3] %v2_v0  ;;  %44 = vst [vmem:[%s135_s1 + $0x6] sm:$0x3] %v2_v0 }
   0x4   :  { %45 = vst [vmem:[%s135_s1 + $0x8] sm:$0x3] %v2_v0  ;;  %46 = vst [vmem:[%s135_s1 + $0xa] sm:$0x3] %v2_v0 }
   0x5   :  { %47 = vst [vmem:[%s135_s1 + $0xc] sm:$0x3] %v2_v0  ;;  %48 = vst [vmem:[%s135_s1 + $0xe] sm:$0x3] %v2_v0 }
   0x6   :  { %49 = vst [vmem:[%s135_s1 + $0x10] sm:$0x3] %v2_v0  ;;  %50 = vst [vmem:[%s135_s1 + $0x12] sm:$0x3] %v2_v0 }
   0x7   :  { %51 = vst [vmem:[%s135_s1 + $0x14] sm:$0x3] %v2_v0  ;;  %52 = vst [vmem:[%s135_s1 + $0x16] sm:$0x3] %v2_v0 }
   0x8   :  { %53 = vst [vmem:[%s135_s1 + $0x18] sm:$0x3] %v2_v0  ;;  %54 = vst [vmem:[%s135_s1 + $0x1a] sm:$0x3] %v2_v0 }
   0x9   :  { %55 = vst [vmem:[%s135_s1 + $0x1c] sm:$0x3] %v2_v0  ;;  %56 = vst [vmem:[%s135_s1 + $0x1e] sm:$0x3] %v2_v0 }
   0xa   :  { %57 = vst [vmem:[%s135_s1 + $0x20] sm:$0x3] %v2_v0  ;;  %58 = vst [vmem:[%s135_s1 + $0x22] sm:$0x3] %v2_v0 }
   0xb   :  { %59 = vst [vmem:[%s135_s1 + $0x24] sm:$0x3] %v2_v0  ;;  %60 = vst [vmem:[%s135_s1 + $0x26] sm:$0x3] %v2_v0 }

// kernel: neighborhood_attention_forward.2
= control target key start
LH: loop header
LB: loop body
LE: loop exit
PB: predicated region body
PF: predicated region fallthrough
CT: control target
= control target key end

     0   :  { %v624_v0 = vmov 0.0   ;;  %vm625_vm0 = vmmov 0   ;;  %vm69_vm1 = vcmask 261120   ;;  %vm136_vm2 = vcmask 523264   ;;  %s879_s3 = inlined_call_operand.vmem [shape: f32[32,64], index: 3, kind: input, shape index: {}]   ;;  %s880_s5 = inlined_call_operand.vmem [shape: f32[64,32], index: 5, kind: input, shape index: {}]   ;;  %s881_s0 = inlined_call_operand.vmem [shape: f32[16,32], index: 0, kind: input, shape index: {}]   ;;  %s882_s11 = inlined_call_operand.vmem [shape: f32[32,32], index: 11, kind: input, shape index: {}]   ;;  %s883_s7 = inlined_call_operand.vmem [shape: f32[32,64], index: 7, kind: input, shape index: {}]   ;;  %s884_s1 = inlined_call_operand.vmem [shape: f32[24,32], index: 1, kind: input, shape index: {}]   ;;  %s885_s4 = inlined_call_operand.vmem [shape: f32[1,64], index: 4, kind: input, shape index: {}]   ;;  %s886_s2 = inlined_call_operand.vmem [shape: f32[24,32], index: 2, kind: input, shape index: {}]   ;;  %s887_s13 = inlined_call_operand.vmem [shape: f32[32,32], index: 13, kind: input, shape index: {}]   ;;  %s888_s9 = inlined_call_operand.vmem [shape: f32[64,32], index: 9, kind: input, shape index: {}]   ;;  %s889_s8 = inlined_call_operand.vmem [shape: f32[1,64], index: 8, kind: input, shape index: {}]   ;;  %s890_s6 = inlined_call_operand.vmem [shape: f32[1,32], index: 6, kind: input, shape index: {}]   ;;  %s891_s15 = inlined_call_operand.vmem [shape: f32[16,32], index: 15, kind: output, shape index: {0}]   ;;  %s892_s12 = inlined_call_operand.vmem [shape: f32[1,32], index: 12, kind: input, shape index: {}]   ;;  %s893_s14 = inlined_call_operand.vmem [shape: f32[1,32], index: 14, kind: input, shape index: {}]   ;;  %s894_s10 = inlined_call_operand.vmem [shape: f32[1,32], index: 10, kind: input, shape index: {}]   ;;  %s895_s16 = inlined_call_operand.vmem [shape: f32[24,32], index: 16, kind: output, shape index: {1}]  }
   0x1   :  { %897 = sst [smem:[#allocation2_spill]] %s879_s3  ;;  %554 = vmatprep.subr.bf16.mxu0 %v624_v0  ;;  %558 = vmatprep.mubr.msk.bf16.mxu0 %vm625_vm0, %v624_v0  ;;  %v117_v6 = vld [vmem:[%s880_s5] sm:$0xff]  ;;  %v118_v7 = vld [vmem:[%s880_s5 + $0x8] sm:$0xff]  ;;  %v119_v8 = vld [vmem:[%s880_s5 + $0x10] sm:$0xff] }
   0x2   :  { %s898_s23 = sld [smem:[#allocation2_spill]]  ;;  %562 = vmatprep.subr.bf16.mxu1 %v624_v0  ;;  %570 = vmatprep.mubr.msk.bf16.mxu1 %vm625_vm0, %v624_v0  ;;  %v53_v10 = vld [vmem:[%s881_s0] sm:$0xff]  ;;  %v54_v11 = vld [vmem:[%s881_s0 + $0x8] sm:$0xff]  ;;  %v125_v12 = vpack.c.bf16 %v118_v7, %v117_v6  ;;  %v120_v13 = vld [vmem:[%s880_s5 + $0x18] sm:$0xff] }
   0x3   :  { %v126_v14 = vpack.c.bf16 %v120_v13, %v119_v8  ;;  %v55_v15 = vpack.c.bf16 %v54_v11, %v53_v10  ;;  %v121_v16 = vld [vmem:[%s880_s5 + $0x20] sm:$0xff]  ;;  %v122_v17 = vld [vmem:[%s880_s5 + $0x28] sm:$0xff]  ;;  %v123_v19 = vld [vmem:[%s880_s5 + $0x30] sm:$0xff] }
   0x4   :  { %563 = vmatpush3.bf16.msra.mxu1 %v125_v12  ;;  %v127_v18 = vpack.c.bf16 %v122_v17, %v121_v16  ;;  %v124_v20 = vld [vmem:[%s880_s5 + $0x38] sm:$0xff]  ;;  %v338_v22 = vld [vmem:[%s882_s11] sm:$0xff]  ;;  %v339_v23 = vld [vmem:[%s882_s11 + $0x8] sm:$0xff] }
   0x5   :  { %564 = vmatprep.subr.bf16.mxu1 %v624_v0  ;;  %v128_v21 = vpack.c.bf16 %v124_v20, %v123_v19  ;;  %v342_v24 = vpack.c.bf16 %v339_v23, %v338_v22  ;;  %v188_v25 = vld [vmem:[%s883_s7] sm:$0xff]  ;;  %v189_v26 = vld [vmem:[%s883_s7 + $0x8] sm:$0xff]  ;;  %v190_v27 = vld [vmem:[%s883_s7 + $0x10] sm:$0xff] }
   0x6   :  { %v192_v28 = vpack.c.bf16 %v189_v26, %v188_v25  ;;  %v191_v29 = vld [vmem:[%s883_s7 + $0x18] sm:$0xff]  ;;  %v183_v30 = vld [vmem:[%s884_s1] sm:$0xff]  ;;  %v184_v31 = vld [vmem:[%s884_s1 + $0x8] sm:$0xff] }
   0x7   :  { %v193_v32 = vpack.c.bf16 %v191_v29, %v190_v27  ;;  %v186_v33 = vpack.c.bf16 %v184_v31, %v183_v30  ;;  %v185_v34 = vld [vmem:[%s884_s1 + $0x10] sm:$0xff]  ;;  %v509_v36 = vld [vmem:[%s885_s4] ss:$0 sm:$0xff]  ;;  %v334_v44 = vld [vmem:[%s886_s2 + $0x8] sm:$0xff] }
   0x8   :  { %v56_v1 = vld [vmem:[%s898_s23] sm:$0xff]  ;;  %v57_v2 = vld [vmem:[%s898_s23 + $0x8] sm:$0xff]  ;;  %v58_v3 = vld [vmem:[%s898_s23 + $0x10] sm:$0xff]  ;;  %565 = vmatpush3.bf16.msra.mxu1 %v126_v14  ;;  %v187_v35 = vpack.c.bf16 %v185_v34, %v185_v34 }
   0x9   :  { %v60_v4 = vpack.c.bf16 %v57_v2, %v56_v1  ;;  %v59_v5 = vld [vmem:[%s898_s23 + $0x18] sm:$0xff]  ;;  %566 = vmatprep.subr.bf16.mxu1 %v624_v0  ;;  %v333_v43 = vld [vmem:[%s886_s2] sm:$0xff]  ;;  %v340_v45 = vld [vmem:[%s882_s11 + $0x10] sm:$0xff] }
   0xa   :  { %v61_v9 = vpack.c.bf16 %v59_v5, %v58_v3  ;;  %v341_v46 = vld [vmem:[%s882_s11 + $0x18] sm:$0xff]  ;;  %v336_v49 = vpack.c.bf16 %v334_v44, %v333_v43  ;;  %v335_v52 = vld [vmem:[%s886_s2 + $0x10] sm:$0xff]  ;;  %v410_v54 = vld [vmem:[%s887_s13] sm:$0xff] }
   0xb   :  { %555 = vmatpush3.bf16.msra.mxu0 %v60_v4  ;;  %v343_v51 = vpack.c.bf16 %v341_v46, %v340_v45  ;;  %v337_v53 = vpack.c.bf16 %v335_v52, %v335_v52  ;;  %v411_v55 = vld [vmem:[%s887_s13 + $0x8] sm:$0xff]  ;;  %v412_v57 = vld [vmem:[%s887_s13 + $0x10] sm:$0xff]  ;;  %v413_v58 = vld [vmem:[%s887_s13 + $0x18] sm:$0xff] }
   0xc   :  { %556 = vmatprep.subr.bf16.mxu0 %v624_v0  ;;  %567 = vmatpush3.bf16.msra.mxu1 %v127_v18  ;;  %v414_v56 = vpack.c.bf16 %v411_v55, %v410_v54  ;;  %v415_v59 = vpack.c.bf16 %v413_v58, %v412_v57  ;;  %v260_v60 = vld [vmem:[%s888_s9] sm:$0xff]  ;;  %v261_v61 = vld [vmem:[%s888_s9 + $0x8] sm:$0xff]  ;;  %v262_v62 = vld [vmem:[%s888_s9 + $0x10] sm:$0xff] }
   0xd   :  { %568 = vmatprep.subr.bf16.mxu1 %v624_v0  ;;  %v268_v63 = vpack.c.bf16 %v261_v61, %v260_v60  ;;  %v263_v0 = vld [vmem:[%s888_s9 + $0x18] sm:$0xff]  ;;  %v513_v2 = vld [vmem:[%s889_s8] ss:$0 sm:$0xff]  ;;  %v265_v6 = vld [vmem:[%s888_s9 + $0x28] sm:$0xff] }
   0xe   :  { %v269_v3 = vpack.c.bf16 %v263_v0, %v262_v62  ;;  %v264_v5 = vld [vmem:[%s888_s9 + $0x20] sm:$0xff]  ;;  %v266_v13 = vld [vmem:[%s888_s9 + $0x30] sm:$0xff]  ;;  %v267_v14 = vld [vmem:[%s888_s9 + $0x38] sm:$0xff] }
   0xf   :  { %557 = vmatpush3.bf16.msra.mxu0 %v61_v9  ;;  %v270_v12 = vpack.c.bf16 %v265_v6, %v264_v5  ;;  %v271_v18 = vpack.c.bf16 %v267_v14, %v266_v13  ;;  %v522_v45 = vld [vmem:[%s893_s14] ss:$0 sm:$0xff] }
  0x10   :  { %569 = vmatpush3.bf16.msra.mxu1 %v128_v21  ;;  %574 = vmatprep.subr.bf16.mxu0 %v192_v28  ;;  %v511_v21 = vld [vmem:[%s890_s6] ss:$0 sm:$0xff] }
  0x11   :  { %594 = vmatprep.subr.bf16.mxu1 %v342_v24  ;;  %v516_v62 = vld [vmem:[%s894_s10] ss:$0 sm:$0xff] }
  0x12   :  { %559 = vmatmul.mubr.msk.bf16.vlgmr.msra.gmra.mrb[0].mxu0 %vm69_vm1, %v55_v15 }
  0x13   :  { %575 = vmatpush3.bf16.msra.mxu0 %v192_v28  ;;  %578 = vmatprep.mubr.msk.bf16.mxu0 %vm69_vm1, %v186_v33  ;;  %v519_v28 = vld [vmem:[%s892_s12] ss:$0 sm:$0xff] }
  0x14   :  { %576 = vmatprep.subr.bf16.mxu0 %v193_v32 }
  0x17   :  { %577 = vmatpush3.bf16.msra.mxu0 %v193_v32 }
  0x18   :  { %582 = vmatprep.subr.bf16.mxu0 %v268_v63 }
  0x1a   :  { %579 = vmatmul.mubr.msk.bf16.vlgmr.msra.gmra.mrb[4].mxu0 %vm69_vm1, %v187_v35 }
  0x1b   :  { %583 = vmatpush3.bf16.msra.mxu0 %v268_v63 }
  0x1c   :  { %584 = vmatprep.subr.bf16.mxu0 %v269_v3 }
  0x1f   :  { %585 = vmatpush3.bf16.msra.mxu0 %v269_v3 }
  0x20   :  { %586 = vmatprep.subr.bf16.mxu0 %v270_v12 }
  0x23   :  { %587 = vmatpush3.bf16.msra.mxu0 %v270_v12 }
  0x24   :  { %588 = vmatprep.subr.bf16.mxu0 %v271_v18 }
  0x27   :  { %589 = vmatpush3.bf16.msra.mxu0 %v271_v18 }
  0xe5   :  { %v107_v37 = vpop.f32.mrb[0].mxu0 }
  0xe6   :  { %v108_v38 = vadd.f32 %v509_v36, %v107_v37  ;;  %v560_v39 = vpop.f32.mrb[1].mxu0 }
  0xe7   :  { %v110_v40 = vpop.f32.mrb[2].mxu0 }
  0xe8   :  { %v111_v41 = vadd.f32 %v509_v36, %v110_v40  ;;  %v561_v42 = vpop.f32.mrb[3].mxu0  ;;  %v114_v47 = vmax.f32 %v108_v38, 0.0 }
  0xea   :  { %v115_v48 = vmax.f32 %v111_v41, 0.0 }
  0xec   :  { %v116_v50 = vpack.c.bf16 %v115_v48, %v114_v47 }
  0xed   :  { %v580_v1 = vpop.f32.mrb[4].mxu0 }
  0xee   :  { %571 = vmatmul.mubr.msk.bf16.vlgmr.msra.gmra.mrb[0].mxu1 %vm136_vm2, %v116_v50  ;;  %v241_v4 = vpop.f32.mrb[5].mxu0  ;;  %v250_v15 = vadd.f32 %v580_v1, %v513_v2 }
  0xef   :  { %595 = vmatpush3.bf16.msra.mxu1 %v342_v24  ;;  %598 = vmatprep.mubr.msk.bf16.mxu1 %vm69_vm1, %v336_v49  ;;  %v242_v7 = vadd.f32 %v513_v2, %v241_v4  ;;  %v581_v8 = vpop.f32.mrb[6].mxu0 }
  0xf0   :  { %596 = vmatprep.subr.bf16.mxu1 %v343_v51  ;;  %v244_v9 = vpop.f32.mrb[7].mxu0  ;;  %v257_v19 = vmax.f32 %v250_v15, 0.0 }
  0xf1   :  { %v255_v10 = vmax.f32 %v242_v7, 0.0  ;;  %v245_v11 = vadd.f32 %v513_v2, %v244_v9 }
  0xf2   :  { %v259_v20 = vpack.c.bf16 %v257_v19, %v257_v19 }
  0xf3   :  { %597 = vmatpush3.bf16.msra.mxu1 %v343_v51  ;;  %v256_v16 = vmax.f32 %v245_v11, 0.0 }
  0xf4   :  { %602 = vmatprep.subr.bf16.mxu1 %v414_v56 }
  0xf5   :  { %v258_v17 = vpack.c.bf16 %v256_v16, %v255_v10 }
  0xf6   :  { %599 = vmatmul.mubr.msk.bf16.vlgmr.msra.gmra.mrb[4].mxu1 %vm69_vm1, %v337_v53 }
  0xf7   :  { %603 = vmatpush3.bf16.msra.mxu1 %v414_v56  ;;  %590 = vmatprep.mubr.msk.bf16.mxu0 %vm136_vm2, %v258_v17 }
  0xf8   :  { %604 = vmatprep.subr.bf16.mxu1 %v415_v59  ;;  %591 = vmatmul.mubr.msk.bf16.vlgmr.msra.gmra.mrb[8].mxu0 %vm136_vm2, %v259_v20 }
  0xfb   :  { %605 = vmatpush3.bf16.msra.mxu1 %v415_v59 }
 0x1c1   :  { %v174_v22 = vpop.f32.mrb[0].mxu1 }
 0x1c2   :  { %v175_v23 = vadd.f32 %v511_v21, %v174_v22  ;;  %v572_v24 = vpop.f32.mrb[1].mxu1 }
 0x1c3   :  { %v177_v25 = vpop.f32.mrb[2].mxu1 }
 0x1c4   :  { %181 = vst.msk [vmem:[%s891_s15] sm:$0xff] %vm69_vm1, %v175_v23  ;;  %v178_v26 = vadd.f32 %v511_v21, %v177_v25  ;;  %v573_v27 = vpop.f32.mrb[3].mxu1 }
 0x1c6   :  { %182 = vst.msk [vmem:[%s891_s15 + $0x8] sm:$0xff] %vm69_vm1, %v178_v26 }
 0x1c9   :  { %v600_v29 = vpop.f32.mrb[4].mxu1 }
 0x1ca   :  { %v400_v30 = vadd.f32 %v600_v29, %v519_v28  ;;  %v391_v31 = vpop.f32.mrb[5].mxu1 }
 0x1cb   :  { %v392_v32 = vadd.f32 %v519_v28, %v391_v31  ;;  %v601_v33 = vpop.f32.mrb[6].mxu1  ;;  %v592_v41 = vpop.f32.mrb[8].mxu0 }
 0x1cc   :  { %v394_v34 = vpop.f32.mrb[7].mxu1  ;;  %v407_v36 = vmax.f32 %v400_v30, 0.0  ;;  %v319_v42 = vpop.f32.mrb[9].mxu0  ;;  %v328_v63 = vadd.f32 %v592_v41, %v516_v62 }
 0x1cd   :  { %v395_v35 = vadd.f32 %v519_v28, %v394_v34  ;;  %v405_v37 = vmax.f32 %v392_v32, 0.0  ;;  %v593_v43 = vpop.f32.mrb[10].mxu0  ;;  %v320_v1 = vadd.f32 %v516_v62, %v319_v42 }
 0x1ce   :  { %v409_v40 = vpack.c.bf16 %v407_v36, %v407_v36  ;;  %v322_v44 = vpop.f32.mrb[11].mxu0 }
 0x1cf   :  { %v406_v38 = vmax.f32 %v395_v35, 0.0  ;;  %v323_v5 = vadd.f32 %v516_v62, %v322_v44 }
 0x1d1   :  { %v408_v39 = vpack.c.bf16 %v406_v38, %v405_v37 }
 0x1d3   :  { %606 = vmatprep.mubr.msk.bf16.mxu1 %vm69_vm1, %v408_v39 }
 0x1d4   :  { %607 = vmatmul.mubr.msk.bf16.vlgmr.msra.gmra.mrb[8].mxu1 %vm69_vm1, %v409_v40 }
 0x2a7   :  { %v608_v46 = vpop.f32.mrb[8].mxu1 }
 0x2a8   :  { %v472_v47 = vadd.f32 %v608_v46, %v522_v45  ;;  %v463_v48 = vpop.f32.mrb[9].mxu1 }
 0x2a9   :  { %v464_v49 = vadd.f32 %v522_v45, %v463_v48  ;;  %v609_v50 = vpop.f32.mrb[10].mxu1 }
 0x2aa   :  { %v527_v51 = vmul.f32 -1.442695, %v472_v47  ;;  %v466_v52 = vpop.f32.mrb[11].mxu1 }
 0x2ab   :  { %v525_v53 = vmul.f32 -1.442695, %v464_v49  ;;  %v467_v54 = vadd.f32 %v522_v45, %v466_v52 }
 0x2ac   :  { %612 = vpow2.f32 %v527_v51 }
 0x2ad   :  { %614 = vpow2.f32 %v525_v53  ;;  %v526_v55 = vmul.f32 -1.442695, %v467_v54 }
 0x2af   :  { %616 = vpow2.f32 %v526_v55 }
 0x2b6   :  { %v613_v56 = vpop.eup %612 }
 0x2b7   :  { %v615_v57 = vpop.eup %614  ;;  %v488_v58 = vadd.f32 1.0, %v613_v56 }
 0x2b8   :  { %v486_v59 = vadd.f32 1.0, %v615_v57 }
 0x2b9   :  { %v617_v60 = vpop.eup %616  ;;  %618 = vrcp.f32 %v488_v58 }
 0x2ba   :  { %620 = vrcp.f32 %v486_v59  ;;  %v487_v61 = vadd.f32 1.0, %v617_v60 }
 0x2bc   :  { %622 = vrcp.f32 %v487_v61 }
 0x2c3   :  { %v619_v0 = vpop.eup %618 }
 0x2c4   :  { %v621_v2 = vpop.eup %620  ;;  %v497_v3 = vmul.f32 %v619_v0, %v328_v63 }
 0x2c5   :  { %v495_v4 = vmul.f32 %v621_v2, %v320_v1 }
 0x2c6   :  { %v623_v6 = vpop.eup %622  ;;  %500 = vst.msk [vmem:[%s895_s16 + $0x10] sm:$0xff] %vm69_vm1, %v497_v3 }
 0x2c7   :  { %498 = vst.msk [vmem:[%s895_s16] sm:$0xff] %vm69_vm1, %v495_v4  ;;  %v496_v7 = vmul.f32 %v623_v6, %v323_v5 }
 0x2c9   :  { %499 = vst.msk [vmem:[%s895_s16 + $0x8] sm:$0xff] %vm69_vm1, %v496_v7 }

// kernel: neighborhood_attention_forward.3
= control target key start
LH: loop header
LB: loop body
LE: loop exit
PB: predicated region body
PF: predicated region fallthrough
CT: control target
= control target key end

     0   :  { %9 = vsyncpa [#allocation3], 0  ;;  %s974_s0 = inlined_call_operand.vmem [shape: s32[16,9], index: 0, kind: input, shape index: {}]   ;;  %s975_s1 = inlined_call_operand.vmem [shape: f32[16,32], index: 1, kind: input, shape index: {}]   ;;  %s976_s2 = inlined_call_operand.vmem [shape: f32[24,32], index: 2, kind: input, shape index: {}]   ;;  %s977_s3 = inlined_call_operand.vmem [shape: f32[24,32], index: 3, kind: input, shape index: {}]   ;;  %s978_s4 = inlined_call_operand.hbm [shape: f32[16,32], index: 4, kind: output, shape index: {}]  }
   0x1   :  { %11 = vsyncpa [#allocation3 + $0x1], 0  ;;  %s788_s15 = smov 0   ;;  %s790_s16 = smov 0  }
   0x2   :  { %s792_s17 = smov 0   ;;  %s794_s18 = smov 0  }
   0x3 LB: > { %s809_s19 = sadd.s32 4294967295, %s749_s18   ;;  %s564_s20 = sadd.s32 4294967294, %s749_s18   ;;  %s749_s18 = sphi %s794_s18, %s984_s18   ;;  %s745_s17 = sphi %s792_s17, %s983_s17   ;;  %s741_s16 = sphi %s790_s16, %s982_s16   ;;  %s737_s15 = sphi %s788_s15, %s981_s15  }
   0x4   : > { %s813_s21 = sadd.s32 1, %s749_s18   ;;  %s118_s22 = sadd.s32 1, %s745_s17 }
   0x5   : > { %s115_s23 = ssub.s32 %s749_s18, %s813_s21  ;;  %p128_p0 = scmp.ne.s32.totalorder %s745_s17, %s741_s16 }
   0x6   : > { %p116_p1 = scmp.eq.s32.totalorder %s115_s23, 0  ;;  %p129_p2 = scmp.eq.s32.totalorder %s809_s19, 1 }
   0x7   : > { %p134_p3 = scmp.ne.s32.totalorder %s741_s16, %s737_s15  ;;  %p135_p4 = scmp.eq.s32.totalorder %s564_s20, 1 }
   0x8   : > { %s824_s24 = scalar_select %p116_p1, %s745_s17, %s118_s22  }
   0x9   : > { %p826_p5 = por %p129_p2, %p128_p0  ;;  %p830_p6 = por %p135_p4, %p134_p3 }
   0xa   : > { %p567_p7 = scmp.ge.s32.totalorder %s749_s18, 1  ;;  %p173_p8 = scmp.lt.s32.totalorder %s749_s18, 3 }
   0xc   : > { %p174_p9 = pnand %p567_p7, %p173_p8 }
   0xd   : > { %v215_v0 = vld [vmem:[%s976_s2] sm:$0xff] (!%p174_p9)  ;;  %v216_v1 = vld [vmem:[%s976_s2 + $0x8] sm:$0xff] (!%p174_p9)  ;;  %vm220_vm0 = vcmask (!%p174_p9), 261120   ;;  %v751_v2 = vmov (!%p174_p9), 0.0   ;;  %vm752_vm1 = vmmov (!%p174_p9), 0   ;;  %p202_p10 = scmp.lt.s32.totalorder (!%p174_p9), %s809_s19, 1  ;;  %v270_v24 = vlaneseq (!%p174_p9) }
   0xe   : > { %177 = sbr.rel (%p174_p9) target bundleno = 671 (0x29f), region = 36  ;;  %592 = vmatprep.subr.bf16.mxu0 (!%p174_p9), %v751_v2  ;;  %v218_v3 = vpack.c.bf16 (!%p174_p9), %v216_v1, %v215_v0  ;;  %596 = vmatprep.mubr.msk.bf16.mxu0 (!%p174_p9), %vm752_vm1, %v751_v2  ;;  %v217_v4 = vld [vmem:[%s976_s2 + $0x10] sm:$0xff] (!%p174_p9)  ;;  %v753_v5 = vmov (!%p174_p9), 2   ;;  %v754_v6 = vmov (!%p174_p9), 0   ;;  %v755_v13 = vmov (!%p174_p9), 3   ;;  %v425_v63 = vld [vmem:[%s977_s3] sm:$0xff] (!%p174_p9) }
   0xf   : > { %660 = vset.pattern.permute.xlu1 (!%p174_p9), %v753_v5  ;;  %658 = vset.pattern.permute.xlu0 (!%p174_p9), %v754_v6  ;;  %v219_v8 = vpack.c.bf16 (!%p174_p9), %v217_v4, %v217_v4  ;;  %v756_v14 = vmov (!%p174_p9), 1   ;;  %v757_v16 = vmov (!%p174_p9), 4   ;;  %v758_v17 = vmov (!%p174_p9), 5   ;;  %v426_v0 = vld [vmem:[%s977_s3 + $0x8] sm:$0xff] (!%p174_p9)  ;;  %v427_v1 = vld [vmem:[%s977_s3 + $0x10] sm:$0xff] (!%p174_p9)  ;;  %s199_s30 = sand.u32 (!%p174_p9), 1, %s741_s16  }
  0x10   : > { %v225_v7 = vsel (!%p174_p9), %vm220_vm0, %v218_v3, 0  ;;  %600 = vmatprep.subr.bf16.mxu1 (!%p174_p9), %v751_v2  ;;  %604 = vmatprep.mubr.msk.bf16.mxu1 (!%p174_p9), %vm752_vm1, %v751_v2  ;;  %v759_v18 = vmov (!%p174_p9), 6   ;;  %v760_v19 = vmov (!%p174_p9), 8   ;;  %v761_v20 = vmov (!%p174_p9), 7   ;;  %s568_s5 = sshll.u32 (!%p174_p9), %s199_s30, 3  ;;  %s583_s6 = sshll.u32 (!%p174_p9), %s809_s19, 7 }
  0x11   : > { %593 = vmatpush3.bf16.xpose.msra.mxu0 (!%p174_p9), %v225_v7  ;;  %v228_v11 = vsel (!%p174_p9), %vm220_vm0, %v219_v8, 0  ;;  %v271_v26 = vand.u32 (!%p174_p9), 127, %v270_v24  ;;  %vm327_vm6 = vcmask (!%p174_p9), 195584   ;;  %v428_v3 = vpack.c.bf16 (!%p174_p9), %v426_v0, %v425_v63  ;;  %s762_s13 = smov (!%p174_p9), [#allocation2]  }
  0x12   : > { %594 = vmatprep.subr.bf16.mxu0 (!%p174_p9), %v751_v2  ;;  %v429_v4 = vpack.c.bf16 (!%p174_p9), %v427_v1, %v427_v1  ;;  %vm433_vm12 = vcmask (!%p174_p9), 1043456  }
  0x13   : > { %601 = vmatpush3.bf16.msra.mxu1 (!%p174_p9), %v428_v3 }
  0x14   : > { %602 = vmatprep.subr.bf16.mxu1 (!%p174_p9), %v751_v2  ;;  %v435_v5 = vsel (!%p174_p9), %vm433_vm12, %v429_v4, 0 }
  0x15   : > { %s203_s7 = scalar_select %p202_p10, %s809_s19, 1 }
  0x16   : > { %s480_s19 = scalar_lea.sflag [#allocation3], %s199_s30 }
  0x17   : > { %s569_s8 = sshll.u32 %s203_s7, 3  ;;  %603 = vmatpush3.bf16.msra.mxu1 %v435_v5  ;;  %s201_s7 = scalar_lea.vmem [#allocation2], %s568_s5 }
  0x18   : > { %s205_s11 = scalar_lea.vmem %s974_s0, %s569_s8  ;;  %s209_s14 = scalar_lea.vmem %s975_s1, %s569_s8 }
  0x19   : > { %v213_v9 = vld [vmem:[%s205_s11] sm:$0xff]  ;;  %595 = vmatpush3.bf16.xpose.msra.mxu0 %v228_v11  ;;  %s493_s8 = sshll.u32 %s201_s7, 4  ;;  %s931_s11 = scalar_lea.hbm %s978_s4, %s583_s6  ;;  %s933_s8 = int_to_ptr.vmem [resolvable:$true] %s493_s8 }
  0x1a   : > { %v211_v10 = vld [vmem:[%s209_s14] sm:$0xff]  ;;  %285 = vperm.xlu1 %660, %v213_v9   ;;  %273 = vperm.xlu0 %658, %v213_v9   ;;  %s687_s12 = scalar_lea.vmem %s933_s8, 128  ;;  %s691_s14 = sshll.u32 %s762_s13, 4  ;;  %s692_s14 = int_to_ptr.vmem [resolvable:$false] %s691_s14 }
  0x1b   : > { %v212_v12 = vmul.f32 0.17677669, %v211_v10  ;;  %p688_p11 = scmp.ne.s32.totalorder %s933_s8, %s687_s12  ;;  %s693_s20 = scalar_lea.vmem %s692_s14, 256 }
  0x1c   : > { %p694_p0 = scmp.lt.s32.totalorder %s933_s8, %s692_s14  ;;  %p695_p1 = scmp.lt.s32.totalorder %s693_s20, %s687_s12 }
  0x1d   : > { %v214_v15 = vpack.c.bf16 %v212_v12, %v212_v12  ;;  %p689_p12 = pnand %p688_p11, %p826_p5 }
  0x1e   : > { %661 = vset.pattern.permute.xlu1 %v755_v13  ;;  %659 = vset.pattern.permute.xlu0 %v756_v14  ;;  %p696_p2 = por %p695_p1, %p694_p0 }
  0x1f   : > { %291 = vperm.xlu1 %661, %v213_v9   ;;  %279 = vperm.xlu0 %659, %v213_v9   ;;  %p690_p13 = pneg %p689_p12 }
  0x20   : > { %597 = vmatmul.mubr.msk.bf16.vlgmr.msra.gmra.mrb[0].mxu0 %vm220_vm0, %v214_v15 }
  0x21   : > { %p697_p3 = pnand %p696_p2, %p690_p13 }
  0x23   : > { %662 = vset.pattern.permute.xlu1 %v757_v16  ;;  %663 = vset.pattern.permute.xlu0 %v758_v17 }
  0x24   : > { %297 = vperm.xlu1 %662, %v213_v9   ;;  %303 = vperm.xlu0 %663, %v213_v9  }
  0x28   : > { %664 = vset.pattern.permute.xlu1 %v759_v18  ;;  %666 = vset.pattern.permute.xlu0 %v760_v19 }
  0x29   : > { %309 = vperm.xlu1 %664, %v213_v9   ;;  %321 = vperm.xlu0 %666, %v213_v9  }
  0x2d   : > { %665 = vset.pattern.permute.xlu1 %v761_v20 }
  0x2e   : > { %315 = vperm.xlu1 %665, %v213_v9  }
  0x99   : > { %v286_v21 = vpop.permute.xlu1 %285  ;;  %v274_v23 = vpop.permute.xlu0 %273 }
  0x9a   : > { %vm275_vm4 = vcmp.eq.s32.totalorder %v271_v26, %v274_v23  ;;  %vm287_vm5 = vcmp.eq.s32.totalorder %v271_v26, %v286_v21 }
  0x9b   : > { %v868_v31 = vsel %vm275_vm4, 1.0, %v751_v2  ;;  %v873_v37 = vsel %vm287_vm5, 1.0, %v751_v2 }
  0x9e   : > { %v292_v22 = vpop.permute.xlu1 %291  ;;  %v280_v27 = vpop.permute.xlu0 %279 }
  0x9f   : > { %vm281_vm2 = vcmp.eq.s32.totalorder %v271_v26, %v280_v27  ;;  %vm293_vm3 = vcmp.eq.s32.totalorder %v271_v26, %v292_v22 }
  0xa0   : > { %v862_v29 = vsel %vm281_vm2, 1.0, %v751_v2  ;;  %v865_v30 = vsel %vm293_vm3, 1.0, %v751_v2 }
  0xa3   : > { %v298_v25 = vpop.permute.xlu1 %297  ;;  %v304_v32 = vpop.permute.xlu0 %303 }
  0xa4   : > { %vm299_vm7 = vcmp.eq.s32.totalorder %v271_v26, %v298_v25  ;;  %vm305_vm8 = vcmp.eq.s32.totalorder %v271_v26, %v304_v32 }
  0xa5   : > { %v880_v45 = vsel %vm299_vm7, 1.0, %v751_v2  ;;  %v883_v46 = vsel %vm305_vm8, 1.0, %v751_v2 }
  0xa8   : > { %v310_v28 = vpop.permute.xlu1 %309  ;;  %v322_v47 = vpop.permute.xlu0 %321 }
  0xa9   : > { %vm311_vm9 = vcmp.eq.s32.totalorder %v271_v26, %v310_v28  ;;  %vm323_vm11 = vcmp.eq.s32.totalorder %v271_v26, %v322_v47 }
  0xaa   : > { %v890_v52 = vsel %vm311_vm9, 1.0, %v751_v2  ;;  %v900_v58 = vsel %vm323_vm11, 1.0, %v751_v2 }
  0xad   : > { %v316_v38 = vpop.permute.xlu1 %315 }
  0xae   : > { %vm317_vm10 = vcmp.eq.s32.totalorder %v271_v26, %v316_v38 }
  0xaf   : > { %v893_v53 = vsel %vm317_vm10, 1.0, %v751_v2 }
  0xf3   : > { %v264_v33 = vpop.f32.mrb[0].mxu0 }
  0xf4   : > { %v598_v34 = vpop.f32.mrb[1].mxu0  ;;  %v326_v35 = vmul.f32 %v868_v31, %v264_v33  ;;  %v331_v36 = vmul.f32 %v862_v29, %v264_v33  ;;  %v335_v43 = vmul.f32 %v873_v37, %v264_v33  ;;  %v339_v44 = vmul.f32 %v865_v30, %v264_v33 }
  0xf5   : > { %v267_v39 = vpop.f32.mrb[2].mxu0  ;;  %v343_v50 = vmul.f32 %v880_v45, %v264_v33  ;;  %v347_v51 = vmul.f32 %v883_v46, %v264_v33  ;;  %v351_v56 = vmul.f32 %v890_v52, %v264_v33  ;;  %v355_v57 = vmul.f32 %v893_v53, %v264_v33 }
  0xf6   : > { %v599_v40 = vpop.f32.mrb[3].mxu0  ;;  %v328_v41 = vsel %vm327_vm6, %v326_v35, 0.0  ;;  %v332_v42 = vsel %vm327_vm6, %v331_v36, 0.0  ;;  %v336_v48 = vsel %vm327_vm6, %v335_v43, 0.0  ;;  %v340_v49 = vsel %vm327_vm6, %v339_v44, 0.0 }
  0xf7   : > { %329 = vadd.xlane.f32.xlu1 %v328_v41  ;;  %333 = vadd.xlane.f32.xlu0 %v332_v42  ;;  %v344_v54 = vsel %vm327_vm6, %v343_v50, 0.0  ;;  %v348_v55 = vsel %vm327_vm6, %v347_v51, 0.0  ;;  %v352_v59 = vsel %vm327_vm6, %v351_v56, 0.0  ;;  %v356_v60 = vsel %vm327_vm6, %v355_v57, 0.0 }
  0xf8   : > { %v359_v61 = vmul.f32 %v900_v58, %v264_v33 }
  0xfa   : > { %v360_v62 = vsel %vm327_vm6, %v359_v61, 0.0 }
  0xfb   : > { %337 = vadd.xlane.f32.xlu1 %v336_v48  ;;  %341 = vadd.xlane.f32.xlu0 %v340_v49 }
  0xff   : > { %345 = vadd.xlane.f32.xlu1 %v344_v54  ;;  %349 = vadd.xlane.f32.xlu0 %v348_v55 }
 0x103   : > { %353 = vadd.xlane.f32.xlu1 %v352_v59  ;;  %357 = vadd.xlane.f32.xlu0 %v356_v60 }
 0x107   : > { %361 = vadd.xlane.f32.xlu1 %v360_v62 }
 0x184   : > { %v330_v6 = vpop.xlane.xlu1 %329  ;;  %v334_v7 = vpop.xlane.xlu0 %333 }
 0x185   : > { %v363_v8 = vmax.f32 %v330_v6, %v334_v7 }
 0x188   : > { %v338_v9 = vpop.xlane.xlu1 %337  ;;  %v342_v10 = vpop.xlane.xlu0 %341 }
 0x189   : > { %v364_v11 = vmax.f32 %v363_v8, %v338_v9 }
 0x18b   : > { %v365_v12 = vmax.f32 %v364_v11, %v342_v10 }
 0x18c   : > { %v346_v13 = vpop.xlane.xlu1 %345  ;;  %v350_v14 = vpop.xlane.xlu0 %349 }
 0x18d   : > { %v366_v15 = vmax.f32 %v365_v12, %v346_v13 }
 0x18f   : > { %v367_v16 = vmax.f32 %v366_v15, %v350_v14 }
 0x190   : > { %v354_v17 = vpop.xlane.xlu1 %353  ;;  %v358_v19 = vpop.xlane.xlu0 %357 }
 0x191   : > { %v368_v18 = vmax.f32 %v367_v16, %v354_v17 }
 0x193   : > { %v369_v20 = vmax.f32 %v368_v18, %v358_v19 }
 0x194   : > { %v362_v21 = vpop.xlane.xlu1 %361 }
 0x195   : > { %v370_v22 = vmax.f32 %v369_v20, %v362_v21 }
 0x197   : > { %v371_v2 = vsub.f32 %v330_v6, %v370_v22  ;;  %v374_v23 = vsub.f32 %v334_v7, %v370_v22  ;;  %v377_v24 = vsub.f32 %v338_v9, %v370_v22  ;;  %v380_v25 = vsub.f32 %v342_v10, %v370_v22 }
 0x198   : > { %v383_v28 = vsub.f32 %v346_v13, %v370_v22  ;;  %v386_v34 = vsub.f32 %v350_v14, %v370_v22  ;;  %v389_v36 = vsub.f32 %v354_v17, %v370_v22  ;;  %v392_v39 = vsub.f32 %v358_v19, %v370_v22 }
 0x199   : > { %v372_v26 = vmul.f32 1.442695, %v371_v2  ;;  %v375_v27 = vmul.f32 1.442695, %v374_v23  ;;  %v378_v32 = vmul.f32 1.442695, %v377_v24  ;;  %v395_v40 = vsub.f32 %v362_v21, %v370_v22 }
 0x19a   : > { %v381_v33 = vmul.f32 1.442695, %v380_v25  ;;  %v384_v35 = vmul.f32 1.442695, %v383_v28  ;;  %v387_v38 = vmul.f32 1.442695, %v386_v34 }
 0x19b   : > { %667 = vpow2.f32 %v372_v26  ;;  %v390_v41 = vmul.f32 1.442695, %v389_v36  ;;  %v393_v42 = vmul.f32 1.442695, %v392_v39  ;;  %v396_v43 = vmul.f32 1.442695, %v395_v40 }
 0x19c   : > { %669 = vpow2.f32 %v375_v27 }
 0x19d   : > { %671 = vpow2.f32 %v378_v32 }
 0x19e   : > { %673 = vpow2.f32 %v381_v33 }
 0x19f   : > { %675 = vpow2.f32 %v384_v35 }
 0x1a0   : > { %677 = vpow2.f32 %v387_v38 }
 0x1a1   : > { %679 = vpow2.f32 %v390_v41 }
 0x1a2   : > { %681 = vpow2.f32 %v393_v42 }
 0x1a3   : > { %683 = vpow2.f32 %v396_v43 }
 0x1a5   : > { %v668_v44 = vpop.eup %667 }
 0x1a6   : > { %v670_v47 = vpop.eup %669  ;;  %v407_v48 = vmul.f32 %v668_v44, %v868_v31 }
 0x1a7   : > { %v672_v49 = vpop.eup %671  ;;  %v408_v50 = vmul.f32 %v670_v47, %v862_v29  ;;  %v398_v51 = vadd.f32 %v670_v47, %v668_v44 }
 0x1a8   : > { %v674_v54 = vpop.eup %673  ;;  %v410_v56 = vmul.f32 %v672_v49, %v873_v37 }
 0x1a9   : > { %v409_v55 = vadd.f32 %v408_v50, %v407_v48  ;;  %v399_v57 = vadd.f32 %v672_v49, %v398_v51  ;;  %v676_v59 = vpop.eup %675  ;;  %v412_v61 = vmul.f32 %v674_v54, %v865_v30 }
 0x1aa   : > { %v678_v63 = vpop.eup %677  ;;  %v414_v1 = vmul.f32 %v676_v59, %v880_v45 }
 0x1ab   : > { %v411_v60 = vadd.f32 %v410_v56, %v409_v55  ;;  %v400_v62 = vadd.f32 %v674_v54, %v399_v57  ;;  %v680_v3 = vpop.eup %679  ;;  %v416_v29 = vmul.f32 %v678_v63, %v883_v46 }
 0x1ac   : > { %v682_v6 = vpop.eup %681  ;;  %v418_v37 = vmul.f32 %v680_v3, %v890_v52 }
 0x1ad   : > { %v413_v0 = vadd.f32 %v412_v61, %v411_v60  ;;  %v401_v31 = vadd.f32 %v676_v59, %v400_v62  ;;  %v684_v9 = vpop.eup %683  ;;  %v420_v10 = vmul.f32 %v682_v6, %v893_v53 }
 0x1ae   : > { %v422_v45 = vmul.f32 %v684_v9, %v900_v58 }
 0x1af   : > { %v415_v4 = vadd.f32 %v414_v1, %v413_v0  ;;  %v402_v5 = vadd.f32 %v678_v63, %v401_v31 }
 0x1b1   : > { %v417_v7 = vadd.f32 %v416_v29, %v415_v4  ;;  %v403_v8 = vadd.f32 %v680_v3, %v402_v5 }
 0x1b3   : > { %v419_v30 = vadd.f32 %v418_v37, %v417_v7  ;;  %v404_v11 = vadd.f32 %v682_v6, %v403_v8 }
 0x1b5   : > { %v421_v12 = vadd.f32 %v420_v10, %v419_v30  ;;  %v405_v13 = vadd.f32 %v684_v9, %v404_v11 }
 0x1b7   : > { %v423_v14 = vadd.f32 %v422_v45, %v421_v12  ;;  %685 = vrcp.f32 %v405_v13 }
 0x1b9   : > { %v424_v15 = vpack.c.bf16 %v423_v14, %v423_v14 }
 0x1bb   : > { %605 = vmatmul.mubr.msk.bf16.vlgmr.msra.gmra.mrb[0].mxu1 %vm327_vm6, %v424_v15 }
 0x1c1   : > { %v686_v46 = vpop.eup %685 }
 0x28e   : > { %v471_v52 = vpop.f32.mrb[0].mxu1 }
 0x28f   : > { %v477_v16 = vmul.f32 %v686_v46, %v471_v52  ;;  %v606_v53 = vpop.f32.mrb[1].mxu1 }
 0x290   : > { %v474_v58 = vpop.f32.mrb[2].mxu1 }
 0x291   : > { %v607_v17 = vpop.f32.mrb[3].mxu1  ;;  %478 = vst.msk [vmem:[%s201_s7] sm:$0xff] %vm220_vm0, %v477_v16 }
 0x292   : > { %700 = shalt.err (!%p697_p3)
}
 0x293   : > { %s701_s22 = scalar_lea.hbm %s931_s11, 128  ;;  %s705_s28 = scalar_lea.hbm %s978_s4, 256 }
 0x294   : > { %p702_p4 = scmp.ne.s32.totalorder %s931_s11, %s701_s22  ;;  %p706_p9 = scmp.lt.u32.totalorder %s931_s11, %s978_s4 }
 0x295   : > { %p707_p10 = scmp.lt.u32.totalorder %s705_s28, %s701_s22  ;;  %p709_p12 = scmp.lt.u32.totalorder %s701_s22, %s931_s11 }
 0x296   : > { %p703_p7 = pnand %p702_p4, %p826_p5 }
 0x297   : > { %p708_p11 = por %p707_p10, %p706_p9 }
 0x298   : > { %p704_p8 = pneg %p703_p7 }
 0x299   : > { %p710_p13 = por %p709_p12, %p708_p11 }
 0x29b   : > { %p711_p0 = pnand %p710_p13, %p704_p8 }
 0x29d   : > { %714 = shalt.err (!%p711_p0)
}
 0x29e   : > { %608 = dma.vmem_to_hbm [thread:$0]  (%p826_p5), %s933_s8, 128, %s931_s11, %s480_s19  }
 0x29f PF: > { %p614_p1 = scmp.ge.s32.totalorder %s749_s18, 2  ;;  %s505_s5 = sand.u32 1, %s737_s15  }
 0x2a0   : > { %s506_s6 = scalar_lea.sflag [#allocation3], %s505_s5 }
 0x2a1   : > { %p611_p2 = pnand %p614_p1, %p830_p6 }
 0x2a3   : > { %732 = dma.done.wait (!%p611_p2), %s506_s6, 128  }
 0x2a4   : > { %734 = vsyncadd (!%p611_p2), %s506_s6, 4294967168  ;;  %p14_p3 = scmp.ge.s32.totalorder %s813_s21, 4   ;;  %s981_s15 = smov %s741_s16 }
 0x2a5   : > { %s982_s16 = smov %s745_s17  ;;  %s983_s17 = smov %s824_s24 }
 0x2a6   : > { %s984_s18 = smov %s813_s21  ;;  %16 = sbr.rel (!%p14_p3) target bundleno = 3 (0x3), region = 74 }
 0x2ad   :  { %511 = vsyncpa [#allocation3], 1 }
 0x2ae   :  { %513 = vsyncpa [#allocation3 + $0x1], 1 }

</bundles_post_ra>
